<compile_context>
chip_gen: v5e
topology: v5e:2x2
jax: 0.10.0
libtpu: 0.0.40
codegen_flags: <defaults>
</compile_context>

<pallas_src>
import numpy as np
import jax
import jax.numpy as jnp
from jax import lax
from jax.experimental import pallas as pl
from jax.experimental.pallas import tpu as pltpu

# ------------------------------ configuration -------------------------------
B = 2                      # batch
S = 8                      # sequence length
VOCAB = 64                 # toy vocab for the RoBERTa stand-in
H_ROB = 32                 # roberta hidden size          (1024 in the original)
H_LSTM = 16                # lstm hidden / direction      (512)
C_IN = 2 * H_LSTM          # BiLSTM output channels       (1024)
NB = 3                     # number of conv1d branches
KERNEL_SIZES = (3, 5, 7)
C_OUT = 16                 # conv1d out channels          (512)
S_POOL = S // 2            # after MaxPool1d(2)
H2, W2 = S_POOL, C_OUT     # conv2d image (H, W)
H2P, W2P = H2 // 2, W2 // 2
C2A = 8                    # conv2d   out channels        (128)
C2B = 8                    # conv2d_2 out channels        (32)
H3P, W3P = H2P // 2, W2P // 2
FEAT = C2B * H3P * W3P     # fc input size (32*64*128 in the original)
D_FC = 64                  # fc hidden                    (256)


# ------------------------------ fused kernel --------------------------------
def _fused_kernel(x_ref, wih_ref, ball_ref, whh_ref, w1d_ref, b1d_ref,
                  wb1_ref, bc1_ref, wb2_ref, bc2_ref,
                  wfc_ref, bfc_ref, wfc2_ref, bfc2_ref,
                  out_ref,
                  hstack_ref, y1_ref, a1_ref):
    f32 = jnp.float32
    bf16 = jnp.bfloat16
    H = H_LSTM

    # ----- BiLSTM: hoisted input projection (one matmul) ---------------------
    # x_ref: (S, H_ROB); g_all columns: [fwd i,f,o,g | bwd i,f,o,g], H each.
    g_all = (jnp.dot(x_ref[...], wih_ref[...], preferred_element_type=f32)
             + ball_ref[...])                                   # (S, 8H)
    whh = whh_ref[...]                                          # (2H, 8H) blk-diag

    # zero-padded hidden-state stack (3 pad rows per side for the 7-tap conv)
    hstack_ref[...] = jnp.zeros((S + 6, 2 * H), f32)

    hc = jnp.zeros((1, 2 * H), f32)                             # [h_fwd | h_bwd]
    c_f = jnp.zeros((1, H), f32)
    c_b = jnp.zeros((1, H), f32)
    for s in range(S):                       # fwd processes t=s, bwd t=S-1-s
        tb = S - 1 - s
        g_rec = jnp.dot(hc.astype(bf16), whh, preferred_element_type=f32)
        g = jnp.concatenate([g_all[s:s + 1, 0:4 * H],
                             g_all[tb:tb + 1, 4 * H:8 * H]], axis=1) + g_rec
        sf = jax.nn.sigmoid(g[:, 0:3 * H])                      # fwd i|f|o
        gf = jnp.tanh(g[:, 3 * H:4 * H])                        # fwd g
        sb = jax.nn.sigmoid(g[:, 4 * H:7 * H])                  # bwd i|f|o
        gb = jnp.tanh(g[:, 7 * H:8 * H])                        # bwd g
        c_f = sf[:, H:2 * H] * c_f + sf[:, 0:H] * gf
        c_b = sb[:, H:2 * H] * c_b + sb[:, 0:H] * gb
        h_f = sf[:, 2 * H:3 * H] * jnp.tanh(c_f)
        h_b = sb[:, 2 * H:3 * H] * jnp.tanh(c_b)
        hstack_ref[pl.ds(3 + s, 1), 0:H] = h_f
        hstack_ref[pl.ds(3 + tb, 1), H:2 * H] = h_b
        hc = jnp.concatenate([h_f, h_b], axis=1)

    # ----- merged Conv1d(k=3,5,7): single im2col matmul + bias + ReLU --------
    hpad = hstack_ref[...]                                      # (S+6, 2H)
    im2col = jnp.concatenate([hpad[j:j + S, :] for j in range(7)],
                             axis=1).astype(bf16)               # (S, 7*2H)
    y1 = (jnp.dot(im2col, w1d_ref[...], preferred_element_type=f32)
          + b1d_ref[...])                                       # (S, NB*C_OUT)
    y1_ref[...] = jnp.maximum(y1, 0.0)

    # ----- MaxPool1d(2) over time: even/odd strided rows ---------------------
    p1 = jnp.maximum(y1_ref[pl.ds(0, S_POOL, stride=2), :],
                     y1_ref[pl.ds(1, S_POOL, stride=2), :])     # (H2, 48)

    # ----- Conv2d(3 -> C2A, 3x3, pad=1) as 3 banded matmuls + ReLU -----------
    zr1 = jnp.zeros((1, NB * C_OUT), f32)
    ppad = jnp.concatenate([zr1, p1, zr1], axis=0).astype(bf16)  # (H2+2, 48)
    a1 = jnp.zeros((H2, W2 * C2A), f32)
    for kh in range(3):
        a1 = a1 + jnp.dot(ppad[kh:kh + H2, :], wb1_ref[kh],
                          preferred_element_type=f32)
    a1_ref[...] = jnp.maximum(a1 + bc1_ref[...], 0.0)           # (H2, 128)

    # ----- MaxPool2d(2,2): H via strided rows, W via shifted lane max --------
    a1h = jnp.maximum(a1_ref[pl.ds(0, H2P, stride=2), :],
                      a1_ref[pl.ds(1, H2P, stride=2), :])       # (H2P, 128)
    # col w*C2A+c of m1 = max over W-pair (w, w+1); only even-w columns are
    # valid, odd ones are killed by zero rows in the banded conv2d_2 weight.
    m1 = jnp.maximum(a1h[:, 0:(W2 - 1) * C2A],
                     a1h[:, C2A:W2 * C2A])                      # (H2P, 120)

    # ----- Conv2d(C2A -> C2B, 3x3, pad=1) as 3 banded matmuls (no ReLU) ------
    zr2 = jnp.zeros((1, (W2 - 1) * C2A), f32)
    mpad = jnp.concatenate([zr2, m1, zr2], axis=0).astype(bf16)  # (H2P+2, 120)
    a2 = jnp.zeros((H2P, W2P * C2B), f32)
    for kh in range(3):
        a2 = a2 + jnp.dot(mpad[kh:kh + H2P, :], wb2_ref[kh],
                          preferred_element_type=f32)
    a2 = a2 + bc2_ref[...]                                      # (H2P, 64)

    # ----- MaxPool2d(2,2) + fc -> fc2 -> sigmoid -----------------------------
    # (nn.Dropout(p=0.3) is identity at inference.)
    feats = []
    for h3 in range(H3P):
        rh = jnp.maximum(a2[2 * h3:2 * h3 + 1, :],
                         a2[2 * h3 + 1:2 * h3 + 2, :])          # (1, 64)
        feats.append(jnp.maximum(rh[:, 0:(W2P - 1) * C2B],
                                 rh[:, C2B:W2P * C2B]))         # (1, 56)
    feat = jnp.concatenate(feats, axis=1).astype(bf16)          # (1, H3P*56)
    hfc = (jnp.dot(feat, wfc_ref[...], preferred_element_type=f32)
           + bfc_ref[...])                                      # (1, D_FC)
    z = (jnp.dot(hfc.astype(bf16), wfc2_ref[...], preferred_element_type=f32)
         + bfc2_ref[...])                                       # (1, 1)
    out_ref[...] = jax.nn.sigmoid(z)


def _bcast_spec(shape):
    return pl.BlockSpec(shape, lambda b: (0,) * len(shape))


# ------------------------------- full forward -------------------------------
def model_forward(packed, input_ids, attention_mask):
    # TODO(synk): the pretrained RoBERTa encoder has no self-contained Pallas
    # equivalent; it is replaced by a deterministic embedding lookup masked by
    # attention_mask, producing `last_hidden_state` (B, S, H_ROB).
    x = packed['emb'][input_ids] * attention_mask[..., None].astype(jnp.float32)
    x = x.astype(jnp.bfloat16)                                  # (B, S, H_ROB)

    weights = (packed['wih'], packed['ball'], packed['whh'],
               packed['w1d'], packed['b1d'],
               packed['wb1'], packed['bc1'], packed['wb2'], packed['bc2'],
               packed['wfc'], packed['bfc'], packed['wfc2'], packed['bfc2'])

    out = pl.pallas_call(
        _fused_kernel,
        grid=(B,),
        in_specs=[pl.BlockSpec((None, S, H_ROB), lambda b: (b, 0, 0))]
                 + [_bcast_spec(w.shape) for w in weights],
        out_specs=pl.BlockSpec((None, 1, 1), lambda b: (b, 0, 0)),
        out_shape=jax.ShapeDtypeStruct((B, 1, 1), jnp.float32),
        scratch_shapes=[pltpu.VMEM((S + 6, 2 * H_LSTM), jnp.float32),
                        pltpu.VMEM((S, NB * C_OUT), jnp.float32),
                        pltpu.VMEM((H2, W2 * C2A), jnp.float32)],
        compiler_params=pltpu.CompilerParams(
            dimension_semantics=("parallel",)),
    )(x, *weights)
    return out[:, 0, 0]                                         # .squeeze(1)


# --------------------- one-time weight packing (hoisted) ---------------------
def prepare_params(params):
    f32 = np.float32
    bf16 = jnp.bfloat16
    H = H_LSTM

    def npy(a):
        return np.asarray(a, dtype=f32)

    # gate reorder: PyTorch rows (i, f, g, o) -> packed columns (i, f, o, g)
    perm = np.concatenate([np.arange(0, 2 * H), np.arange(3 * H, 4 * H),
                           np.arange(2 * H, 3 * H)])

    w_ih_f = npy(params['w_ih_f'])[perm]
    w_ih_b = npy(params['w_ih_b'])[perm]
    wih_all = np.concatenate([w_ih_f.T, w_ih_b.T], axis=1)       # (H_ROB, 8H)
    b_f = (npy(params['b_ih_f']) + npy(params['b_hh_f']))[perm]
    b_b = (npy(params['b_ih_b']) + npy(params['b_hh_b']))[perm]
    b_all = np.concatenate([b_f, b_b]).reshape(1, 8 * H)
    whh_bd = np.zeros((2 * H, 8 * H), f32)                       # block-diagonal
    whh_bd[0:H, 0:4 * H] = npy(params['w_hh_f'])[perm].T
    whh_bd[H:2 * H, 4 * H:8 * H] = npy(params['w_hh_b'])[perm].T

    # merged 7-tap Conv1d weight, im2col layout; columns ordered w*NB + branch
    w1d = np.zeros((7 * C_IN, NB * C_OUT), f32)
    b1d = np.zeros((1, NB * C_OUT), f32)
    for br, k in enumerate(KERNEL_SIZES):
        w = npy(params['conv_w'][br])                            # (C_OUT, C_IN, k)
        off = (7 - k) // 2
        for j in range(k):
            tap = off + j
            w1d[tap * C_IN:(tap + 1) * C_IN, br::NB] = w[:, :, j].T
        b1d[0, br::NB] = npy(params['conv_b'][br])

    # banded Conv2d(3 -> C2A): (3, NB*C_OUT, W2*C2A); rows w_in*NB+ci, cols w*C2A+co
    w2d1 = npy(params['conv2d_w'])                               # (C2A, NB, 3, 3)
    wb1 = np.zeros((3, NB * C_OUT, W2 * C2A), f32)
    for kh in range(3):
        for w_out in range(W2):
            for kw in range(3):
                w_in = w_out + kw - 1
                if 0 <= w_in < W2:
                    wb1[kh, w_in * NB:(w_in + 1) * NB,
                        w_out * C2A:(w_out + 1) * C2A] = w2d1[:, :, kh, kw].T
    bc1 = np.tile(npy(params['conv2d_b']), W2).reshape(1, W2 * C2A)

    # banded Conv2d(C2A -> C2B): rows only at even-w blocks of the shifted max
    w2d2 = npy(params['conv2d2_w'])                              # (C2B, C2A, 3, 3)
    K2 = (W2 - 1) * C2A
    wb2 = np.zeros((3, K2, W2P * C2B), f32)
    for kh in range(3):
        for wp_out in range(W2P):
            for kw in range(3):
                wp_in = wp_out + kw - 1
                if 0 <= wp_in < W2P:
                    w_row = 2 * wp_in
                    wb2[kh, w_row * C2A:(w_row + 1) * C2A,
                        wp_out * C2B:(wp_out + 1) * C2B] = w2d2[:, :, kh, kw].T
    bc2 = np.tile(npy(params['conv2d2_b']), W2P).reshape(1, W2P * C2B)

    # fc weight: rows at (h3, even wp, co) positions of the shifted-max feature
    fc_w = npy(params['fc_w'])                                   # (D_FC, FEAT)
    KW3 = (W2P - 1) * C2B
    wfc = np.zeros((H3P * KW3, D_FC), f32)
    for h3 in range(H3P):
        for wq in range(W3P):
            for co in range(C2B):
                row = h3 * KW3 + (2 * wq) * C2B + co
                feat_idx = co * (H3P * W3P) + h3 * W3P + wq      # PyTorch (c,h,w)
                wfc[row, :] = fc_w[:, feat_idx]
    bfc = npy(params['fc_b']).reshape(1, D_FC)
    wfc2 = npy(params['fc2_w']).T                                # (D_FC, 1)
    bfc2 = npy(params['fc2_b']).reshape(1, 1)

    return {
        'emb': params['emb'],
        'wih': jnp.asarray(wih_all, bf16), 'ball': jnp.asarray(b_all),
        'whh': jnp.asarray(whh_bd, bf16),
        'w1d': jnp.asarray(w1d, bf16), 'b1d': jnp.asarray(b1d),
        'wb1': jnp.asarray(wb1, bf16), 'bc1': jnp.asarray(bc1),
        'wb2': jnp.asarray(wb2, bf16), 'bc2': jnp.asarray(bc2),
        'wfc': jnp.asarray(wfc, bf16), 'bfc': jnp.asarray(bfc),
        'wfc2': jnp.asarray(wfc2, bf16), 'bfc2': jnp.asarray(bfc2),
    }


# ------------------------- deterministic parameters --------------------------
def init_params(key):
    ks = jax.random.split(key, 24)

    def u(k, shape, scale=0.1):
        return jax.random.uniform(k, shape, jnp.float32, -1.0, 1.0) * scale

    return {
        'emb': u(ks[0], (VOCAB, H_ROB), 0.5),
        'w_ih_f': u(ks[1], (4 * H_LSTM, H_ROB)),
        'w_hh_f': u(ks[2], (4 * H_LSTM, H_LSTM)),
        'b_ih_f': u(ks[3], (4 * H_LSTM,)),
        'b_hh_f': u(ks[4], (4 * H_LSTM,)),
        'w_ih_b': u(ks[5], (4 * H_LSTM, H_ROB)),
        'w_hh_b': u(ks[6], (4 * H_LSTM, H_LSTM)),
        'b_ih_b': u(ks[7], (4 * H_LSTM,)),
        'b_hh_b': u(ks[8], (4 * H_LSTM,)),
        'conv_w': [u(ks[9 + i], (C_OUT, C_IN, k))
                   for i, k in enumerate(KERNEL_SIZES)],
        'conv_b': [u(ks[12 + i], (C_OUT,)) for i in range(NB)],
        'conv2d_w': u(ks[15], (C2A, NB, 3, 3)),
        'conv2d_b': u(ks[16], (C2A,)),
        'conv2d2_w': u(ks[17], (C2B, C2A, 3, 3)),
        'conv2d2_b': u(ks[18], (C2B,)),
        'fc_w': u(ks[19], (D_FC, FEAT)),
        'fc_b': u(ks[20], (D_FC,)),
        'fc2_w': u(ks[21], (1, D_FC)),
        'fc2_b': u(ks[22], (1,)),
    }


# ---------------------------- pure-JAX reference -----------------------------
def reference_forward(params, input_ids, attention_mask):
    x = params['emb'][input_ids] * attention_mask[..., None].astype(jnp.float32)
    H = H_LSTM

    def lstm_dir(xs, wih, whh, b):
        def step(carry, x_t):
            h, c = carry
            g = x_t @ wih.T + h @ whh.T + b
            i = jax.nn.sigmoid(g[:, :H]); f = jax.nn.sigmoid(g[:, H:2 * H])
            gg = jnp.tanh(g[:, 2 * H:3 * H]); o = jax.nn.sigmoid(g[:, 3 * H:])
            c = f * c + i * gg
            h = o * jnp.tanh(c)
            return (h, c), h
        h0 = jnp.zeros((xs.shape[1], H)); c0 = jnp.zeros((xs.shape[1], H))
        _, hs = lax.scan(step, (h0, c0), xs)
        return hs

    xs = jnp.transpose(x, (1, 0, 2))
    fwd = lstm_dir(xs, params['w_ih_f'], params['w_hh_f'],
                   params['b_ih_f'] + params['b_hh_f'])
    bwd = lstm_dir(xs[::-1], params['w_ih_b'], params['w_hh_b'],
                   params['b_ih_b'] + params['b_hh_b'])[::-1]
    lstm_out = jnp.transpose(jnp.concatenate([fwd, bwd], axis=-1), (1, 0, 2))

    xc = jnp.transpose(lstm_out, (0, 2, 1))                     # (B, C_IN, S)
    branch_maps = []
    for k, w, b in zip(KERNEL_SIZES, params['conv_w'], params['conv_b']):
        pad = (k - 1) // 2
        y = lax.conv_general_dilated(xc, w, (1,), [(pad, pad)],
                                     dimension_numbers=('NCH', 'OIH', 'NCH'))
        y = jnp.maximum(y + b[None, :, None], 0.0)
        pooled = jnp.max(y.reshape(B, C_OUT, S_POOL, 2), axis=-1)
        branch_maps.append(jnp.transpose(pooled, (0, 2, 1)))
    img = jnp.stack(branch_maps, axis=1)                        # (B, 3, H2, W2)

    y1 = lax.conv_general_dilated(img, params['conv2d_w'], (1, 1),
                                  [(1, 1), (1, 1)],
                                  dimension_numbers=('NCHW', 'OIHW', 'NCHW'))
    y1 = jnp.maximum(y1 + params['conv2d_b'][None, :, None, None], 0.0)
    p1 = jnp.max(y1.reshape(B, C2A, H2P, 2, W2P, 2), axis=(3, 5))
    y2 = lax.conv_general_dilated(p1, params['conv2d2_w'], (1, 1),
                                  [(1, 1), (1, 1)],
                                  dimension_numbers=('NCHW', 'OIHW', 'NCHW'))
    y2 = y2 + params['conv2d2_b'][None, :, None, None]          # no ReLU
    p2 = jnp.max(y2.reshape(B, C2B, H3P, 2, W3P, 2), axis=(3, 5))
    feat = p2.reshape(B, -1)
    h = feat @ params['fc_w'].T + params['fc_b']
    z = h @ params['fc2_w'].T + params['fc2_b']
    return jax.nn.sigmoid(z)[:, 0]


if __name__ == "__main__":
    key = jax.random.PRNGKey(0)
    pkey, ikey = jax.random.split(key)
    params = init_params(pkey)
    packed = prepare_params(params)        # one-time packing, hoisted out of forward
    input_ids = jax.random.randint(ikey, (B, S), 0, VOCAB, dtype=jnp.int32)
    attention_mask = jnp.ones((B, S), dtype=jnp.int32)

    fwd = jax.jit(model_forward)
    out = jax.block_until_ready(fwd(packed, input_ids, attention_mask))

    ref = reference_forward(params, input_ids, attention_mask)
    assert out.shape == (B,), out.shape
    assert bool(jnp.all(jnp.isfinite(out)))
    # bf16 matmul operands (f32 accumulation) vs the f32 reference
    assert jnp.allclose(out, ref, atol=1e-2, rtol=1e-2), (out, ref)
    print("KERNEL_OK")
</pallas_src>

<mosaic_0001>
module attributes {stable_mosaic.version = 11 : i64} {
  func.func @_fused_kernel(%arg0: i32, %arg1: memref<1x8x32xbf16, #tpu.memory_space<vmem>>, %arg2: memref<32x128xbf16, #tpu.memory_space<vmem>>, %arg3: memref<1x128xf32, #tpu.memory_space<vmem>>, %arg4: memref<32x128xbf16, #tpu.memory_space<vmem>>, %arg5: memref<224x48xbf16, #tpu.memory_space<vmem>>, %arg6: memref<1x48xf32, #tpu.memory_space<vmem>>, %arg7: memref<3x48x128xbf16, #tpu.memory_space<vmem>>, %arg8: memref<1x128xf32, #tpu.memory_space<vmem>>, %arg9: memref<3x120x64xbf16, #tpu.memory_space<vmem>>, %arg10: memref<1x64xf32, #tpu.memory_space<vmem>>, %arg11: memref<56x64xbf16, #tpu.memory_space<vmem>>, %arg12: memref<1x64xf32, #tpu.memory_space<vmem>>, %arg13: memref<64x1xbf16, #tpu.memory_space<vmem>>, %arg14: memref<1x1xf32, #tpu.memory_space<vmem>>, %arg15: memref<1x1x1xf32, #tpu.memory_space<vmem>>, %arg16: memref<14x32xf32, #tpu.memory_space<vmem>>, %arg17: memref<8x48xf32, #tpu.memory_space<vmem>>, %arg18: memref<4x128xf32, #tpu.memory_space<vmem>>) attributes {dimension_semantics = [#tpu.dimension_semantics<parallel>], iteration_bounds = array<i64: 2>, scalar_prefetch = 0 : i64, scratch_operands = 3 : i64, tpu.core_type = #tpu.core_type<tc>, window_params = [{transform_indices = @transform_0, window_bounds = array<i64: 1, 8, 32>}, {pipeline_mode = #tpu.pipeline_mode<synchronous>, transform_indices = @transform_1, window_bounds = array<i64: 32, 128>}, {pipeline_mode = #tpu.pipeline_mode<synchronous>, transform_indices = @transform_2, window_bounds = array<i64: 1, 128>}, {pipeline_mode = #tpu.pipeline_mode<synchronous>, transform_indices = @transform_3, window_bounds = array<i64: 32, 128>}, {pipeline_mode = #tpu.pipeline_mode<synchronous>, transform_indices = @transform_4, window_bounds = array<i64: 224, 48>}, {pipeline_mode = #tpu.pipeline_mode<synchronous>, transform_indices = @transform_5, window_bounds = array<i64: 1, 48>}, {pipeline_mode = #tpu.pipeline_mode<synchronous>, transform_indices = @transform_6, window_bounds = array<i64: 3, 48, 128>}, {pipeline_mode = #tpu.pipeline_mode<synchronous>, transform_indices = @transform_7, window_bounds = array<i64: 1, 128>}, {pipeline_mode = #tpu.pipeline_mode<synchronous>, transform_indices = @transform_8, window_bounds = array<i64: 3, 120, 64>}, {pipeline_mode = #tpu.pipeline_mode<synchronous>, transform_indices = @transform_9, window_bounds = array<i64: 1, 64>}, {pipeline_mode = #tpu.pipeline_mode<synchronous>, transform_indices = @transform_10, window_bounds = array<i64: 56, 64>}, {pipeline_mode = #tpu.pipeline_mode<synchronous>, transform_indices = @transform_11, window_bounds = array<i64: 1, 64>}, {pipeline_mode = #tpu.pipeline_mode<synchronous>, transform_indices = @transform_12, window_bounds = array<i64: 64, 1>}, {pipeline_mode = #tpu.pipeline_mode<synchronous>, transform_indices = @transform_13, window_bounds = array<i64: 1, 1>}, {transform_indices = @transform_14, window_bounds = array<i64: 1, 1, 1>}]} {
    %c0 = arith.constant 0 : index
    %c0_0 = arith.constant 0 : index
    %c0_1 = arith.constant 0 : index
    %0 = vector.load %arg1[%c0, %c0_0, %c0_1] : memref<1x8x32xbf16, #tpu.memory_space<vmem>>, vector<1x8x32xbf16>
    %1 = vector.shape_cast %0 : vector<1x8x32xbf16> to vector<8x32xbf16>
    %c0_2 = arith.constant 0 : index
    %c0_3 = arith.constant 0 : index
    %2 = vector.load %arg2[%c0_2, %c0_3] : memref<32x128xbf16, #tpu.memory_space<vmem>>, vector<32x128xbf16>
    %cst = arith.constant dense<0.000000e+00> : vector<8x128xf32>
    %3 = tpu.matmul %1, %2, %cst {dimension_numbers = #tpu.dot_dimension_numbers<[1], [0], [0], [1], [0, 0, 1, 1], [], []>} : vector<8x32xbf16>, vector<32x128xbf16>, vector<8x128xf32> -> vector<8x128xf32>
    %c0_4 = arith.constant 0 : index
    %c0_5 = arith.constant 0 : index
    %4 = vector.load %arg3[%c0_4, %c0_5] : memref<1x128xf32, #tpu.memory_space<vmem>>, vector<1x128xf32>
    %5 = vector.broadcast %4 : vector<1x128xf32> to vector<8x128xf32>
    %6 = arith.addf %3, %5 : vector<8x128xf32>
    %c0_6 = arith.constant 0 : index
    %c0_7 = arith.constant 0 : index
    %7 = vector.load %arg4[%c0_6, %c0_7] : memref<32x128xbf16, #tpu.memory_space<vmem>>, vector<32x128xbf16>
    %cst_8 = arith.constant 0.000000e+00 : f32
    %8 = vector.broadcast %cst_8 : f32 to vector<14x32xf32>
    %c0_9 = arith.constant 0 : index
    %c0_10 = arith.constant 0 : index
    %9 = vector.load %arg16[%c0_9, %c0_10] : memref<14x32xf32, #tpu.memory_space<vmem>>, vector<14x32xf32>
    tpu.vector_store %arg16[%c0_9, %c0_10], %8 {strides = array<i32>} : memref<14x32xf32, #tpu.memory_space<vmem>>, vector<14x32xf32>,
    %cst_11 = arith.constant 0.000000e+00 : f32
    %10 = vector.broadcast %cst_11 : f32 to vector<1x32xf32>
    %cst_12 = arith.constant 0.000000e+00 : f32
    %11 = vector.broadcast %cst_12 : f32 to vector<1x16xf32>
    %cst_13 = arith.constant 0.000000e+00 : f32
    %12 = vector.broadcast %cst_13 : f32 to vector<1x16xf32>
    %13 = arith.truncf %10 : vector<1x32xf32> to vector<1x32xbf16>
    %cst_14 = arith.constant dense<0.000000e+00> : vector<1x128xf32>
    %14 = tpu.matmul %13, %7, %cst_14 {dimension_numbers = #tpu.dot_dimension_numbers<[1], [0], [0], [1], [0, 0, 1, 1], [], []>} : vector<1x32xbf16>, vector<32x128xbf16>, vector<1x128xf32> -> vector<1x128xf32>
    %15 = vector.extract_strided_slice %6 {offsets = [0, 0], sizes = [1, 64], strides = [1, 1]} : vector<8x128xf32> to vector<1x64xf32>
    %16 = vector.extract_strided_slice %6 {offsets = [7, 64], sizes = [1, 64], strides = [1, 1]} : vector<8x128xf32> to vector<1x64xf32>
    %17 = tpu.concatenate %15, %16 in 1 : vector<1x64xf32>, vector<1x64xf32> -> vector<1x128xf32>
    %18 = arith.addf %17, %14 : vector<1x128xf32>
    %19 = vector.extract_strided_slice %18 {offsets = [0, 0], sizes = [1, 48], strides = [1, 1]} : vector<1x128xf32> to vector<1x48xf32>
    %20 = arith.negf %19 : vector<1x48xf32>
    %21 = math.exp %20 : vector<1x48xf32>
    %cst_15 = arith.constant 1.000000e+00 : f32
    %22 = vector.broadcast %cst_15 : f32 to vector<1x48xf32>
    %23 = arith.addf %22, %21 : vector<1x48xf32>
    %24 = arith.divf %22, %23 : vector<1x48xf32>
    %25 = vector.extract_strided_slice %18 {offsets = [0, 48], sizes = [1, 16], strides = [1, 1]} : vector<1x128xf32> to vector<1x16xf32>
    %26 = math.tanh %25 : vector<1x16xf32>
    %27 = vector.extract_strided_slice %18 {offsets = [0, 64], sizes = [1, 48], strides = [1, 1]} : vector<1x128xf32> to vector<1x48xf32>
    %28 = arith.negf %27 : vector<1x48xf32>
    %29 = math.exp %28 : vector<1x48xf32>
    %cst_16 = arith.constant 1.000000e+00 : f32
    %30 = vector.broadcast %cst_16 : f32 to vector<1x48xf32>
    %31 = arith.addf %30, %29 : vector<1x48xf32>
    %32 = arith.divf %30, %31 : vector<1x48xf32>
    %33 = vector.extract_strided_slice %18 {offsets = [0, 112], sizes = [1, 16], strides = [1, 1]} : vector<1x128xf32> to vector<1x16xf32>
    %34 = math.tanh %33 : vector<1x16xf32>
    %35 = vector.extract_strided_slice %24 {offsets = [0, 16], sizes = [1, 16], strides = [1, 1]} : vector<1x48xf32> to vector<1x16xf32>
    %36 = arith.mulf %35, %11 : vector<1x16xf32>
    %37 = vector.extract_strided_slice %24 {offsets = [0, 0], sizes = [1, 16], strides = [1, 1]} : vector<1x48xf32> to vector<1x16xf32>
    %38 = arith.mulf %37, %26 : vector<1x16xf32>
    %39 = arith.addf %36, %38 : vector<1x16xf32>
    %40 = vector.extract_strided_slice %32 {offsets = [0, 16], sizes = [1, 16], strides = [1, 1]} : vector<1x48xf32> to vector<1x16xf32>
    %41 = arith.mulf %40, %12 : vector<1x16xf32>
    %42 = vector.extract_strided_slice %32 {offsets = [0, 0], sizes = [1, 16], strides = [1, 1]} : vector<1x48xf32> to vector<1x16xf32>
    %43 = arith.mulf %42, %34 : vector<1x16xf32>
    %44 = arith.addf %41, %43 : vector<1x16xf32>
    %45 = vector.extract_strided_slice %24 {offsets = [0, 32], sizes = [1, 16], strides = [1, 1]} : vector<1x48xf32> to vector<1x16xf32>
    %46 = math.tanh %39 : vector<1x16xf32>
    %47 = arith.mulf %45, %46 : vector<1x16xf32>
    %48 = vector.extract_strided_slice %32 {offsets = [0, 32], sizes = [1, 16], strides = [1, 1]} : vector<1x48xf32> to vector<1x16xf32>
    %49 = math.tanh %44 : vector<1x16xf32>
    %50 = arith.mulf %48, %49 : vector<1x16xf32>
    %c3 = arith.constant 3 : index
    %c0_17 = arith.constant 0 : index
    %51 = vector.load %arg16[%c3, %c0_17] : memref<14x32xf32, #tpu.memory_space<vmem>>, vector<1x16xf32>
    tpu.vector_store %arg16[%c3, %c0_17], %47 {strides = array<i32>} : memref<14x32xf32, #tpu.memory_space<vmem>>, vector<1x16xf32>,
    %c10 = arith.constant 10 : index
    %c16 = arith.constant 16 : index
    %52 = vector.load %arg16[%c10, %c16] : memref<14x32xf32, #tpu.memory_space<vmem>>, vector<1x16xf32>
    tpu.vector_store %arg16[%c10, %c16], %50 {strides = array<i32>} : memref<14x32xf32, #tpu.memory_space<vmem>>, vector<1x16xf32>,
    %53 = tpu.concatenate %47, %50 in 1 : vector<1x16xf32>, vector<1x16xf32> -> vector<1x32xf32>
    %54 = arith.truncf %53 : vector<1x32xf32> to vector<1x32xbf16>
    %cst_18 = arith.constant dense<0.000000e+00> : vector<1x128xf32>
    %55 = tpu.matmul %54, %7, %cst_18 {dimension_numbers = #tpu.dot_dimension_numbers<[1], [0], [0], [1], [0, 0, 1, 1], [], []>} : vector<1x32xbf16>, vector<32x128xbf16>, vector<1x128xf32> -> vector<1x128xf32>
    %56 = vector.extract_strided_slice %6 {offsets = [1, 0], sizes = [1, 64], strides = [1, 1]} : vector<8x128xf32> to vector<1x64xf32>
    %57 = vector.extract_strided_slice %6 {offsets = [6, 64], sizes = [1, 64], strides = [1, 1]} : vector<8x128xf32> to vector<1x64xf32>
    %58 = tpu.concatenate %56, %57 in 1 : vector<1x64xf32>, vector<1x64xf32> -> vector<1x128xf32>
    %59 = arith.addf %58, %55 : vector<1x128xf32>
    %60 = vector.extract_strided_slice %59 {offsets = [0, 0], sizes = [1, 48], strides = [1, 1]} : vector<1x128xf32> to vector<1x48xf32>
    %61 = arith.negf %60 : vector<1x48xf32>
    %62 = math.exp %61 : vector<1x48xf32>
    %cst_19 = arith.constant 1.000000e+00 : f32
    %63 = vector.broadcast %cst_19 : f32 to vector<1x48xf32>
    %64 = arith.addf %63, %62 : vector<1x48xf32>
    %65 = arith.divf %63, %64 : vector<1x48xf32>
    %66 = vector.extract_strided_slice %59 {offsets = [0, 48], sizes = [1, 16], strides = [1, 1]} : vector<1x128xf32> to vector<1x16xf32>
    %67 = math.tanh %66 : vector<1x16xf32>
    %68 = vector.extract_strided_slice %59 {offsets = [0, 64], sizes = [1, 48], strides = [1, 1]} : vector<1x128xf32> to vector<1x48xf32>
    %69 = arith.negf %68 : vector<1x48xf32>
    %70 = math.exp %69 : vector<1x48xf32>
    %cst_20 = arith.constant 1.000000e+00 : f32
    %71 = vector.broadcast %cst_20 : f32 to vector<1x48xf32>
    %72 = arith.addf %71, %70 : vector<1x48xf32>
    %73 = arith.divf %71, %72 : vector<1x48xf32>
    %74 = vector.extract_strided_slice %59 {offsets = [0, 112], sizes = [1, 16], strides = [1, 1]} : vector<1x128xf32> to vector<1x16xf32>
    %75 = math.tanh %74 : vector<1x16xf32>
    %76 = vector.extract_strided_slice %65 {offsets = [0, 16], sizes = [1, 16], strides = [1, 1]} : vector<1x48xf32> to vector<1x16xf32>
    %77 = arith.mulf %76, %39 : vector<1x16xf32>
    %78 = vector.extract_strided_slice %65 {offsets = [0, 0], sizes = [1, 16], strides = [1, 1]} : vector<1x48xf32> to vector<1x16xf32>
    %79 = arith.mulf %78, %67 : vector<1x16xf32>
    %80 = arith.addf %77, %79 : vector<1x16xf32>
    %81 = vector.extract_strided_slice %73 {offsets = [0, 16], sizes = [1, 16], strides = [1, 1]} : vector<1x48xf32> to vector<1x16xf32>
    %82 = arith.mulf %81, %44 : vector<1x16xf32>
    %83 = vector.extract_strided_slice %73 {offsets = [0, 0], sizes = [1, 16], strides = [1, 1]} : vector<1x48xf32> to vector<1x16xf32>
    %84 = arith.mulf %83, %75 : vector<1x16xf32>
    %85 = arith.addf %82, %84 : vector<1x16xf32>
    %86 = vector.extract_strided_slice %65 {offsets = [0, 32], sizes = [1, 16], strides = [1, 1]} : vector<1x48xf32> to vector<1x16xf32>
    %87 = math.tanh %80 : vector<1x16xf32>
    %88 = arith.mulf %86, %87 : vector<1x16xf32>
    %89 = vector.extract_strided_slice %73 {offsets = [0, 32], sizes = [1, 16], strides = [1, 1]} : vector<1x48xf32> to vector<1x16xf32>
    %90 = math.tanh %85 : vector<1x16xf32>
    %91 = arith.mulf %89, %90 : vector<1x16xf32>
    %c4 = arith.constant 4 : index
    %c0_21 = arith.constant 0 : index
    %92 = vector.load %arg16[%c4, %c0_21] : memref<14x32xf32, #tpu.memory_space<vmem>>, vector<1x16xf32>
    tpu.vector_store %arg16[%c4, %c0_21], %88 {strides = array<i32>} : memref<14x32xf32, #tpu.memory_space<vmem>>, vector<1x16xf32>,
    %c9 = arith.constant 9 : index
    %c16_22 = arith.constant 16 : index
    %93 = vector.load %arg16[%c9, %c16_22] : memref<14x32xf32, #tpu.memory_space<vmem>>, vector<1x16xf32>
    tpu.vector_store %arg16[%c9, %c16_22], %91 {strides = array<i32>} : memref<14x32xf32, #tpu.memory_space<vmem>>, vector<1x16xf32>,
    %94 = tpu.concatenate %88, %91 in 1 : vector<1x16xf32>, vector<1x16xf32> -> vector<1x32xf32>
    %95 = arith.truncf %94 : vector<1x32xf32> to vector<1x32xbf16>
    %cst_23 = arith.constant dense<0.000000e+00> : vector<1x128xf32>
    %96 = tpu.matmul %95, %7, %cst_23 {dimension_numbers = #tpu.dot_dimension_numbers<[1], [0], [0], [1], [0, 0, 1, 1], [], []>} : vector<1x32xbf16>, vector<32x128xbf16>, vector<1x128xf32> -> vector<1x128xf32>
    %97 = vector.extract_strided_slice %6 {offsets = [2, 0], sizes = [1, 64], strides = [1, 1]} : vector<8x128xf32> to vector<1x64xf32>
    %98 = vector.extract_strided_slice %6 {offsets = [5, 64], sizes = [1, 64], strides = [1, 1]} : vector<8x128xf32> to vector<1x64xf32>
    %99 = tpu.concatenate %97, %98 in 1 : vector<1x64xf32>, vector<1x64xf32> -> vector<1x128xf32>
    %100 = arith.addf %99, %96 : vector<1x128xf32>
    %101 = vector.extract_strided_slice %100 {offsets = [0, 0], sizes = [1, 48], strides = [1, 1]} : vector<1x128xf32> to vector<1x48xf32>
    %102 = arith.negf %101 : vector<1x48xf32>
    %103 = math.exp %102 : vector<1x48xf32>
    %cst_24 = arith.constant 1.000000e+00 : f32
    %104 = vector.broadcast %cst_24 : f32 to vector<1x48xf32>
    %105 = arith.addf %104, %103 : vector<1x48xf32>
    %106 = arith.divf %104, %105 : vector<1x48xf32>
    %107 = vector.extract_strided_slice %100 {offsets = [0, 48], sizes = [1, 16], strides = [1, 1]} : vector<1x128xf32> to vector<1x16xf32>
    %108 = math.tanh %107 : vector<1x16xf32>
    %109 = vector.extract_strided_slice %100 {offsets = [0, 64], sizes = [1, 48], strides = [1, 1]} : vector<1x128xf32> to vector<1x48xf32>
    %110 = arith.negf %109 : vector<1x48xf32>
    %111 = math.exp %110 : vector<1x48xf32>
    %cst_25 = arith.constant 1.000000e+00 : f32
    %112 = vector.broadcast %cst_25 : f32 to vector<1x48xf32>
    %113 = arith.addf %112, %111 : vector<1x48xf32>
    %114 = arith.divf %112, %113 : vector<1x48xf32>
    %115 = vector.extract_strided_slice %100 {offsets = [0, 112], sizes = [1, 16], strides = [1, 1]} : vector<1x128xf32> to vector<1x16xf32>
    %116 = math.tanh %115 : vector<1x16xf32>
    %117 = vector.extract_strided_slice %106 {offsets = [0, 16], sizes = [1, 16], strides = [1, 1]} : vector<1x48xf32> to vector<1x16xf32>
    %118 = arith.mulf %117, %80 : vector<1x16xf32>
    %119 = vector.extract_strided_slice %106 {offsets = [0, 0], sizes = [1, 16], strides = [1, 1]} : vector<1x48xf32> to vector<1x16xf32>
    %120 = arith.mulf %119, %108 : vector<1x16xf32>
    %121 = arith.addf %118, %120 : vector<1x16xf32>
    %122 = vector.extract_strided_slice %114 {offsets = [0, 16], sizes = [1, 16], strides = [1, 1]} : vector<1x48xf32> to vector<1x16xf32>
    %123 = arith.mulf %122, %85 : vector<1x16xf32>
    %124 = vector.extract_strided_slice %114 {offsets = [0, 0], sizes = [1, 16], strides = [1, 1]} : vector<1x48xf32> to vector<1x16xf32>
    %125 = arith.mulf %124, %116 : vector<1x16xf32>
    %126 = arith.addf %123, %125 : vector<1x16xf32>
    %127 = vector.extract_strided_slice %106 {offsets = [0, 32], sizes = [1, 16], strides = [1, 1]} : vector<1x48xf32> to vector<1x16xf32>
    %128 = math.tanh %121 : vector<1x16xf32>
    %129 = arith.mulf %127, %128 : vector<1x16xf32>
    %130 = vector.extract_strided_slice %114 {offsets = [0, 32], sizes = [1, 16], strides = [1, 1]} : vector<1x48xf32> to vector<1x16xf32>
    %131 = math.tanh %126 : vector<1x16xf32>
    %132 = arith.mulf %130, %131 : vector<1x16xf32>
    %c5 = arith.constant 5 : index
    %c0_26 = arith.constant 0 : index
    %133 = vector.load %arg16[%c5, %c0_26] : memref<14x32xf32, #tpu.memory_space<vmem>>, vector<1x16xf32>
    tpu.vector_store %arg16[%c5, %c0_26], %129 {strides = array<i32>} : memref<14x32xf32, #tpu.memory_space<vmem>>, vector<1x16xf32>,
    %c8 = arith.constant 8 : index
    %c16_27 = arith.constant 16 : index
    %134 = vector.load %arg16[%c8, %c16_27] : memref<14x32xf32, #tpu.memory_space<vmem>>, vector<1x16xf32>
    tpu.vector_store %arg16[%c8, %c16_27], %132 {strides = array<i32>} : memref<14x32xf32, #tpu.memory_space<vmem>>, vector<1x16xf32>,
    %135 = tpu.concatenate %129, %132 in 1 : vector<1x16xf32>, vector<1x16xf32> -> vector<1x32xf32>
    %136 = arith.truncf %135 : vector<1x32xf32> to vector<1x32xbf16>
    %cst_28 = arith.constant dense<0.000000e+00> : vector<1x128xf32>
    %137 = tpu.matmul %136, %7, %cst_28 {dimension_numbers = #tpu.dot_dimension_numbers<[1], [0], [0], [1], [0, 0, 1, 1], [], []>} : vector<1x32xbf16>, vector<32x128xbf16>, vector<1x128xf32> -> vector<1x128xf32>
    %138 = vector.extract_strided_slice %6 {offsets = [3, 0], sizes = [1, 64], strides = [1, 1]} : vector<8x128xf32> to vector<1x64xf32>
    %139 = vector.extract_strided_slice %6 {offsets = [4, 64], sizes = [1, 64], strides = [1, 1]} : vector<8x128xf32> to vector<1x64xf32>
    %140 = tpu.concatenate %138, %139 in 1 : vector<1x64xf32>, vector<1x64xf32> -> vector<1x128xf32>
    %141 = arith.addf %140, %137 : vector<1x128xf32>
    %142 = vector.extract_strided_slice %141 {offsets = [0, 0], sizes = [1, 48], strides = [1, 1]} : vector<1x128xf32> to vector<1x48xf32>
    %143 = arith.negf %142 : vector<1x48xf32>
    %144 = math.exp %143 : vector<1x48xf32>
    %cst_29 = arith.constant 1.000000e+00 : f32
    %145 = vector.broadcast %cst_29 : f32 to vector<1x48xf32>
    %146 = arith.addf %145, %144 : vector<1x48xf32>
    %147 = arith.divf %145, %146 : vector<1x48xf32>
    %148 = vector.extract_strided_slice %141 {offsets = [0, 48], sizes = [1, 16], strides = [1, 1]} : vector<1x128xf32> to vector<1x16xf32>
    %149 = math.tanh %148 : vector<1x16xf32>
    %150 = vector.extract_strided_slice %141 {offsets = [0, 64], sizes = [1, 48], strides = [1, 1]} : vector<1x128xf32> to vector<1x48xf32>
    %151 = arith.negf %150 : vector<1x48xf32>
    %152 = math.exp %151 : vector<1x48xf32>
    %cst_30 = arith.constant 1.000000e+00 : f32
    %153 = vector.broadcast %cst_30 : f32 to vector<1x48xf32>
    %154 = arith.addf %153, %152 : vector<1x48xf32>
    %155 = arith.divf %153, %154 : vector<1x48xf32>
    %156 = vector.extract_strided_slice %141 {offsets = [0, 112], sizes = [1, 16], strides = [1, 1]} : vector<1x128xf32> to vector<1x16xf32>
    %157 = math.tanh %156 : vector<1x16xf32>
    %158 = vector.extract_strided_slice %147 {offsets = [0, 16], sizes = [1, 16], strides = [1, 1]} : vector<1x48xf32> to vector<1x16xf32>
    %159 = arith.mulf %158, %121 : vector<1x16xf32>
    %160 = vector.extract_strided_slice %147 {offsets = [0, 0], sizes = [1, 16], strides = [1, 1]} : vector<1x48xf32> to vector<1x16xf32>
    %161 = arith.mulf %160, %149 : vector<1x16xf32>
    %162 = arith.addf %159, %161 : vector<1x16xf32>
    %163 = vector.extract_strided_slice %155 {offsets = [0, 16], sizes = [1, 16], strides = [1, 1]} : vector<1x48xf32> to vector<1x16xf32>
    %164 = arith.mulf %163, %126 : vector<1x16xf32>
    %165 = vector.extract_strided_slice %155 {offsets = [0, 0], sizes = [1, 16], strides = [1, 1]} : vector<1x48xf32> to vector<1x16xf32>
    %166 = arith.mulf %165, %157 : vector<1x16xf32>
    %167 = arith.addf %164, %166 : vector<1x16xf32>
    %168 = vector.extract_strided_slice %147 {offsets = [0, 32], sizes = [1, 16], strides = [1, 1]} : vector<1x48xf32> to vector<1x16xf32>
    %169 = math.tanh %162 : vector<1x16xf32>
    %170 = arith.mulf %168, %169 : vector<1x16xf32>
    %171 = vector.extract_strided_slice %155 {offsets = [0, 32], sizes = [1, 16], strides = [1, 1]} : vector<1x48xf32> to vector<1x16xf32>
    %172 = math.tanh %167 : vector<1x16xf32>
    %173 = arith.mulf %171, %172 : vector<1x16xf32>
    %c6 = arith.constant 6 : index
    %c0_31 = arith.constant 0 : index
    %174 = vector.load %arg16[%c6, %c0_31] : memref<14x32xf32, #tpu.memory_space<vmem>>, vector<1x16xf32>
    tpu.vector_store %arg16[%c6, %c0_31], %170 {strides = array<i32>} : memref<14x32xf32, #tpu.memory_space<vmem>>, vector<1x16xf32>,
    %c7 = arith.constant 7 : index
    %c16_32 = arith.constant 16 : index
    %175 = vector.load %arg16[%c7, %c16_32] : memref<14x32xf32, #tpu.memory_space<vmem>>, vector<1x16xf32>
    tpu.vector_store %arg16[%c7, %c16_32], %173 {strides = array<i32>} : memref<14x32xf32, #tpu.memory_space<vmem>>, vector<1x16xf32>,
    %176 = tpu.concatenate %170, %173 in 1 : vector<1x16xf32>, vector<1x16xf32> -> vector<1x32xf32>
    %177 = arith.truncf %176 : vector<1x32xf32> to vector<1x32xbf16>
    %cst_33 = arith.constant dense<0.000000e+00> : vector<1x128xf32>
    %178 = tpu.matmul %177, %7, %cst_33 {dimension_numbers = #tpu.dot_dimension_numbers<[1], [0], [0], [1], [0, 0, 1, 1], [], []>} : vector<1x32xbf16>, vector<32x128xbf16>, vector<1x128xf32> -> vector<1x128xf32>
    %179 = vector.extract_strided_slice %6 {offsets = [4, 0], sizes = [1, 64], strides = [1, 1]} : vector<8x128xf32> to vector<1x64xf32>
    %180 = vector.extract_strided_slice %6 {offsets = [3, 64], sizes = [1, 64], strides = [1, 1]} : vector<8x128xf32> to vector<1x64xf32>
    %181 = tpu.concatenate %179, %180 in 1 : vector<1x64xf32>, vector<1x64xf32> -> vector<1x128xf32>
    %182 = arith.addf %181, %178 : vector<1x128xf32>
    %183 = vector.extract_strided_slice %182 {offsets = [0, 0], sizes = [1, 48], strides = [1, 1]} : vector<1x128xf32> to vector<1x48xf32>
    %184 = arith.negf %183 : vector<1x48xf32>
    %185 = math.exp %184 : vector<1x48xf32>
    %cst_34 = arith.constant 1.000000e+00 : f32
    %186 = vector.broadcast %cst_34 : f32 to vector<1x48xf32>
    %187 = arith.addf %186, %185 : vector<1x48xf32>
    %188 = arith.divf %186, %187 : vector<1x48xf32>
    %189 = vector.extract_strided_slice %182 {offsets = [0, 48], sizes = [1, 16], strides = [1, 1]} : vector<1x128xf32> to vector<1x16xf32>
    %190 = math.tanh %189 : vector<1x16xf32>
    %191 = vector.extract_strided_slice %182 {offsets = [0, 64], sizes = [1, 48], strides = [1, 1]} : vector<1x128xf32> to vector<1x48xf32>
    %192 = arith.negf %191 : vector<1x48xf32>
    %193 = math.exp %192 : vector<1x48xf32>
    %cst_35 = arith.constant 1.000000e+00 : f32
    %194 = vector.broadcast %cst_35 : f32 to vector<1x48xf32>
    %195 = arith.addf %194, %193 : vector<1x48xf32>
    %196 = arith.divf %194, %195 : vector<1x48xf32>
    %197 = vector.extract_strided_slice %182 {offsets = [0, 112], sizes = [1, 16], strides = [1, 1]} : vector<1x128xf32> to vector<1x16xf32>
    %198 = math.tanh %197 : vector<1x16xf32>
    %199 = vector.extract_strided_slice %188 {offsets = [0, 16], sizes = [1, 16], strides = [1, 1]} : vector<1x48xf32> to vector<1x16xf32>
    %200 = arith.mulf %199, %162 : vector<1x16xf32>
    %201 = vector.extract_strided_slice %188 {offsets = [0, 0], sizes = [1, 16], strides = [1, 1]} : vector<1x48xf32> to vector<1x16xf32>
    %202 = arith.mulf %201, %190 : vector<1x16xf32>
    %203 = arith.addf %200, %202 : vector<1x16xf32>
    %204 = vector.extract_strided_slice %196 {offsets = [0, 16], sizes = [1, 16], strides = [1, 1]} : vector<1x48xf32> to vector<1x16xf32>
    %205 = arith.mulf %204, %167 : vector<1x16xf32>
    %206 = vector.extract_strided_slice %196 {offsets = [0, 0], sizes = [1, 16], strides = [1, 1]} : vector<1x48xf32> to vector<1x16xf32>
    %207 = arith.mulf %206, %198 : vector<1x16xf32>
    %208 = arith.addf %205, %207 : vector<1x16xf32>
    %209 = vector.extract_strided_slice %188 {offsets = [0, 32], sizes = [1, 16], strides = [1, 1]} : vector<1x48xf32> to vector<1x16xf32>
    %210 = math.tanh %203 : vector<1x16xf32>
    %211 = arith.mulf %209, %210 : vector<1x16xf32>
    %212 = vector.extract_strided_slice %196 {offsets = [0, 32], sizes = [1, 16], strides = [1, 1]} : vector<1x48xf32> to vector<1x16xf32>
    %213 = math.tanh %208 : vector<1x16xf32>
    %214 = arith.mulf %212, %213 : vector<1x16xf32>
    %c7_36 = arith.constant 7 : index
    %c0_37 = arith.constant 0 : index
    %215 = vector.load %arg16[%c7_36, %c0_37] : memref<14x32xf32, #tpu.memory_space<vmem>>, vector<1x16xf32>
    tpu.vector_store %arg16[%c7_36, %c0_37], %211 {strides = array<i32>} : memref<14x32xf32, #tpu.memory_space<vmem>>, vector<1x16xf32>,
    %c6_38 = arith.constant 6 : index
    %c16_39 = arith.constant 16 : index
    %216 = vector.load %arg16[%c6_38, %c16_39] : memref<14x32xf32, #tpu.memory_space<vmem>>, vector<1x16xf32>
    tpu.vector_store %arg16[%c6_38, %c16_39], %214 {strides = array<i32>} : memref<14x32xf32, #tpu.memory_space<vmem>>, vector<1x16xf32>,
    %217 = tpu.concatenate %211, %214 in 1 : vector<1x16xf32>, vector<1x16xf32> -> vector<1x32xf32>
    %218 = arith.truncf %217 : vector<1x32xf32> to vector<1x32xbf16>
    %cst_40 = arith.constant dense<0.000000e+00> : vector<1x128xf32>
    %219 = tpu.matmul %218, %7, %cst_40 {dimension_numbers = #tpu.dot_dimension_numbers<[1], [0], [0], [1], [0, 0, 1, 1], [], []>} : vector<1x32xbf16>, vector<32x128xbf16>, vector<1x128xf32> -> vector<1x128xf32>
    %220 = vector.extract_strided_slice %6 {offsets = [5, 0], sizes = [1, 64], strides = [1, 1]} : vector<8x128xf32> to vector<1x64xf32>
    %221 = vector.extract_strided_slice %6 {offsets = [2, 64], sizes = [1, 64], strides = [1, 1]} : vector<8x128xf32> to vector<1x64xf32>
    %222 = tpu.concatenate %220, %221 in 1 : vector<1x64xf32>, vector<1x64xf32> -> vector<1x128xf32>
    %223 = arith.addf %222, %219 : vector<1x128xf32>
    %224 = vector.extract_strided_slice %223 {offsets = [0, 0], sizes = [1, 48], strides = [1, 1]} : vector<1x128xf32> to vector<1x48xf32>
    %225 = arith.negf %224 : vector<1x48xf32>
    %226 = math.exp %225 : vector<1x48xf32>
    %cst_41 = arith.constant 1.000000e+00 : f32
    %227 = vector.broadcast %cst_41 : f32 to vector<1x48xf32>
    %228 = arith.addf %227, %226 : vector<1x48xf32>
    %229 = arith.divf %227, %228 : vector<1x48xf32>
    %230 = vector.extract_strided_slice %223 {offsets = [0, 48], sizes = [1, 16], strides = [1, 1]} : vector<1x128xf32> to vector<1x16xf32>
    %231 = math.tanh %230 : vector<1x16xf32>
    %232 = vector.extract_strided_slice %223 {offsets = [0, 64], sizes = [1, 48], strides = [1, 1]} : vector<1x128xf32> to vector<1x48xf32>
    %233 = arith.negf %232 : vector<1x48xf32>
    %234 = math.exp %233 : vector<1x48xf32>
    %cst_42 = arith.constant 1.000000e+00 : f32
    %235 = vector.broadcast %cst_42 : f32 to vector<1x48xf32>
    %236 = arith.addf %235, %234 : vector<1x48xf32>
    %237 = arith.divf %235, %236 : vector<1x48xf32>
    %238 = vector.extract_strided_slice %223 {offsets = [0, 112], sizes = [1, 16], strides = [1, 1]} : vector<1x128xf32> to vector<1x16xf32>
    %239 = math.tanh %238 : vector<1x16xf32>
    %240 = vector.extract_strided_slice %229 {offsets = [0, 16], sizes = [1, 16], strides = [1, 1]} : vector<1x48xf32> to vector<1x16xf32>
    %241 = arith.mulf %240, %203 : vector<1x16xf32>
    %242 = vector.extract_strided_slice %229 {offsets = [0, 0], sizes = [1, 16], strides = [1, 1]} : vector<1x48xf32> to vector<1x16xf32>
    %243 = arith.mulf %242, %231 : vector<1x16xf32>
    %244 = arith.addf %241, %243 : vector<1x16xf32>
    %245 = vector.extract_strided_slice %237 {offsets = [0, 16], sizes = [1, 16], strides = [1, 1]} : vector<1x48xf32> to vector<1x16xf32>
    %246 = arith.mulf %245, %208 : vector<1x16xf32>
    %247 = vector.extract_strided_slice %237 {offsets = [0, 0], sizes = [1, 16], strides = [1, 1]} : vector<1x48xf32> to vector<1x16xf32>
    %248 = arith.mulf %247, %239 : vector<1x16xf32>
    %249 = arith.addf %246, %248 : vector<1x16xf32>
    %250 = vector.extract_strided_slice %229 {offsets = [0, 32], sizes = [1, 16], strides = [1, 1]} : vector<1x48xf32> to vector<1x16xf32>
    %251 = math.tanh %244 : vector<1x16xf32>
    %252 = arith.mulf %250, %251 : vector<1x16xf32>
    %253 = vector.extract_strided_slice %237 {offsets = [0, 32], sizes = [1, 16], strides = [1, 1]} : vector<1x48xf32> to vector<1x16xf32>
    %254 = math.tanh %249 : vector<1x16xf32>
    %255 = arith.mulf %253, %254 : vector<1x16xf32>
    %c8_43 = arith.constant 8 : index
    %c0_44 = arith.constant 0 : index
    %256 = vector.load %arg16[%c8_43, %c0_44] : memref<14x32xf32, #tpu.memory_space<vmem>>, vector<1x16xf32>
    tpu.vector_store %arg16[%c8_43, %c0_44], %252 {strides = array<i32>} : memref<14x32xf32, #tpu.memory_space<vmem>>, vector<1x16xf32>,
    %c5_45 = arith.constant 5 : index
    %c16_46 = arith.constant 16 : index
    %257 = vector.load %arg16[%c5_45, %c16_46] : memref<14x32xf32, #tpu.memory_space<vmem>>, vector<1x16xf32>
    tpu.vector_store %arg16[%c5_45, %c16_46], %255 {strides = array<i32>} : memref<14x32xf32, #tpu.memory_space<vmem>>, vector<1x16xf32>,
    %258 = tpu.concatenate %252, %255 in 1 : vector<1x16xf32>, vector<1x16xf32> -> vector<1x32xf32>
    %259 = arith.truncf %258 : vector<1x32xf32> to vector<1x32xbf16>
    %cst_47 = arith.constant dense<0.000000e+00> : vector<1x128xf32>
    %260 = tpu.matmul %259, %7, %cst_47 {dimension_numbers = #tpu.dot_dimension_numbers<[1], [0], [0], [1], [0, 0, 1, 1], [], []>} : vector<1x32xbf16>, vector<32x128xbf16>, vector<1x128xf32> -> vector<1x128xf32>
    %261 = vector.extract_strided_slice %6 {offsets = [6, 0], sizes = [1, 64], strides = [1, 1]} : vector<8x128xf32> to vector<1x64xf32>
    %262 = vector.extract_strided_slice %6 {offsets = [1, 64], sizes = [1, 64], strides = [1, 1]} : vector<8x128xf32> to vector<1x64xf32>
    %263 = tpu.concatenate %261, %262 in 1 : vector<1x64xf32>, vector<1x64xf32> -> vector<1x128xf32>
    %264 = arith.addf %263, %260 : vector<1x128xf32>
    %265 = vector.extract_strided_slice %264 {offsets = [0, 0], sizes = [1, 48], strides = [1, 1]} : vector<1x128xf32> to vector<1x48xf32>
    %266 = arith.negf %265 : vector<1x48xf32>
    %267 = math.exp %266 : vector<1x48xf32>
    %cst_48 = arith.constant 1.000000e+00 : f32
    %268 = vector.broadcast %cst_48 : f32 to vector<1x48xf32>
    %269 = arith.addf %268, %267 : vector<1x48xf32>
    %270 = arith.divf %268, %269 : vector<1x48xf32>
    %271 = vector.extract_strided_slice %264 {offsets = [0, 48], sizes = [1, 16], strides = [1, 1]} : vector<1x128xf32> to vector<1x16xf32>
    %272 = math.tanh %271 : vector<1x16xf32>
    %273 = vector.extract_strided_slice %264 {offsets = [0, 64], sizes = [1, 48], strides = [1, 1]} : vector<1x128xf32> to vector<1x48xf32>
    %274 = arith.negf %273 : vector<1x48xf32>
    %275 = math.exp %274 : vector<1x48xf32>
    %cst_49 = arith.constant 1.000000e+00 : f32
    %276 = vector.broadcast %cst_49 : f32 to vector<1x48xf32>
    %277 = arith.addf %276, %275 : vector<1x48xf32>
    %278 = arith.divf %276, %277 : vector<1x48xf32>
    %279 = vector.extract_strided_slice %264 {offsets = [0, 112], sizes = [1, 16], strides = [1, 1]} : vector<1x128xf32> to vector<1x16xf32>
    %280 = math.tanh %279 : vector<1x16xf32>
    %281 = vector.extract_strided_slice %270 {offsets = [0, 16], sizes = [1, 16], strides = [1, 1]} : vector<1x48xf32> to vector<1x16xf32>
    %282 = arith.mulf %281, %244 : vector<1x16xf32>
    %283 = vector.extract_strided_slice %270 {offsets = [0, 0], sizes = [1, 16], strides = [1, 1]} : vector<1x48xf32> to vector<1x16xf32>
    %284 = arith.mulf %283, %272 : vector<1x16xf32>
    %285 = arith.addf %282, %284 : vector<1x16xf32>
    %286 = vector.extract_strided_slice %278 {offsets = [0, 16], sizes = [1, 16], strides = [1, 1]} : vector<1x48xf32> to vector<1x16xf32>
    %287 = arith.mulf %286, %249 : vector<1x16xf32>
    %288 = vector.extract_strided_slice %278 {offsets = [0, 0], sizes = [1, 16], strides = [1, 1]} : vector<1x48xf32> to vector<1x16xf32>
    %289 = arith.mulf %288, %280 : vector<1x16xf32>
    %290 = arith.addf %287, %289 : vector<1x16xf32>
    %291 = vector.extract_strided_slice %270 {offsets = [0, 32], sizes = [1, 16], strides = [1, 1]} : vector<1x48xf32> to vector<1x16xf32>
    %292 = math.tanh %285 : vector<1x16xf32>
    %293 = arith.mulf %291, %292 : vector<1x16xf32>
    %294 = vector.extract_strided_slice %278 {offsets = [0, 32], sizes = [1, 16], strides = [1, 1]} : vector<1x48xf32> to vector<1x16xf32>
    %295 = math.tanh %290 : vector<1x16xf32>
    %296 = arith.mulf %294, %295 : vector<1x16xf32>
    %c9_50 = arith.constant 9 : index
    %c0_51 = arith.constant 0 : index
    %297 = vector.load %arg16[%c9_50, %c0_51] : memref<14x32xf32, #tpu.memory_space<vmem>>, vector<1x16xf32>
    tpu.vector_store %arg16[%c9_50, %c0_51], %293 {strides = array<i32>} : memref<14x32xf32, #tpu.memory_space<vmem>>, vector<1x16xf32>,
    %c4_52 = arith.constant 4 : index
    %c16_53 = arith.constant 16 : index
    %298 = vector.load %arg16[%c4_52, %c16_53] : memref<14x32xf32, #tpu.memory_space<vmem>>, vector<1x16xf32>
    tpu.vector_store %arg16[%c4_52, %c16_53], %296 {strides = array<i32>} : memref<14x32xf32, #tpu.memory_space<vmem>>, vector<1x16xf32>,
    %299 = tpu.concatenate %293, %296 in 1 : vector<1x16xf32>, vector<1x16xf32> -> vector<1x32xf32>
    %300 = arith.truncf %299 : vector<1x32xf32> to vector<1x32xbf16>
    %cst_54 = arith.constant dense<0.000000e+00> : vector<1x128xf32>
    %301 = tpu.matmul %300, %7, %cst_54 {dimension_numbers = #tpu.dot_dimension_numbers<[1], [0], [0], [1], [0, 0, 1, 1], [], []>} : vector<1x32xbf16>, vector<32x128xbf16>, vector<1x128xf32> -> vector<1x128xf32>
    %302 = vector.extract_strided_slice %6 {offsets = [7, 0], sizes = [1, 64], strides = [1, 1]} : vector<8x128xf32> to vector<1x64xf32>
    %303 = vector.extract_strided_slice %6 {offsets = [0, 64], sizes = [1, 64], strides = [1, 1]} : vector<8x128xf32> to vector<1x64xf32>
    %304 = tpu.concatenate %302, %303 in 1 : vector<1x64xf32>, vector<1x64xf32> -> vector<1x128xf32>
    %305 = arith.addf %304, %301 : vector<1x128xf32>
    %306 = vector.extract_strided_slice %305 {offsets = [0, 0], sizes = [1, 48], strides = [1, 1]} : vector<1x128xf32> to vector<1x48xf32>
    %307 = arith.negf %306 : vector<1x48xf32>
    %308 = math.exp %307 : vector<1x48xf32>
    %cst_55 = arith.constant 1.000000e+00 : f32
    %309 = vector.broadcast %cst_55 : f32 to vector<1x48xf32>
    %310 = arith.addf %309, %308 : vector<1x48xf32>
    %311 = arith.divf %309, %310 : vector<1x48xf32>
    %312 = vector.extract_strided_slice %305 {offsets = [0, 48], sizes = [1, 16], strides = [1, 1]} : vector<1x128xf32> to vector<1x16xf32>
    %313 = math.tanh %312 : vector<1x16xf32>
    %314 = vector.extract_strided_slice %305 {offsets = [0, 64], sizes = [1, 48], strides = [1, 1]} : vector<1x128xf32> to vector<1x48xf32>
    %315 = arith.negf %314 : vector<1x48xf32>
    %316 = math.exp %315 : vector<1x48xf32>
    %cst_56 = arith.constant 1.000000e+00 : f32
    %317 = vector.broadcast %cst_56 : f32 to vector<1x48xf32>
    %318 = arith.addf %317, %316 : vector<1x48xf32>
    %319 = arith.divf %317, %318 : vector<1x48xf32>
    %320 = vector.extract_strided_slice %305 {offsets = [0, 112], sizes = [1, 16], strides = [1, 1]} : vector<1x128xf32> to vector<1x16xf32>
    %321 = math.tanh %320 : vector<1x16xf32>
    %322 = vector.extract_strided_slice %311 {offsets = [0, 16], sizes = [1, 16], strides = [1, 1]} : vector<1x48xf32> to vector<1x16xf32>
    %323 = arith.mulf %322, %285 : vector<1x16xf32>
    %324 = vector.extract_strided_slice %311 {offsets = [0, 0], sizes = [1, 16], strides = [1, 1]} : vector<1x48xf32> to vector<1x16xf32>
    %325 = arith.mulf %324, %313 : vector<1x16xf32>
    %326 = arith.addf %323, %325 : vector<1x16xf32>
    %327 = vector.extract_strided_slice %319 {offsets = [0, 16], sizes = [1, 16], strides = [1, 1]} : vector<1x48xf32> to vector<1x16xf32>
    %328 = arith.mulf %327, %290 : vector<1x16xf32>
    %329 = vector.extract_strided_slice %319 {offsets = [0, 0], sizes = [1, 16], strides = [1, 1]} : vector<1x48xf32> to vector<1x16xf32>
    %330 = arith.mulf %329, %321 : vector<1x16xf32>
    %331 = arith.addf %328, %330 : vector<1x16xf32>
    %332 = vector.extract_strided_slice %311 {offsets = [0, 32], sizes = [1, 16], strides = [1, 1]} : vector<1x48xf32> to vector<1x16xf32>
    %333 = math.tanh %326 : vector<1x16xf32>
    %334 = arith.mulf %332, %333 : vector<1x16xf32>
    %335 = vector.extract_strided_slice %319 {offsets = [0, 32], sizes = [1, 16], strides = [1, 1]} : vector<1x48xf32> to vector<1x16xf32>
    %336 = math.tanh %331 : vector<1x16xf32>
    %337 = arith.mulf %335, %336 : vector<1x16xf32>
    %c10_57 = arith.constant 10 : index
    %c0_58 = arith.constant 0 : index
    %338 = vector.load %arg16[%c10_57, %c0_58] : memref<14x32xf32, #tpu.memory_space<vmem>>, vector<1x16xf32>
    tpu.vector_store %arg16[%c10_57, %c0_58], %334 {strides = array<i32>} : memref<14x32xf32, #tpu.memory_space<vmem>>, vector<1x16xf32>,
    %c3_59 = arith.constant 3 : index
    %c16_60 = arith.constant 16 : index
    %339 = vector.load %arg16[%c3_59, %c16_60] : memref<14x32xf32, #tpu.memory_space<vmem>>, vector<1x16xf32>
    tpu.vector_store %arg16[%c3_59, %c16_60], %337 {strides = array<i32>} : memref<14x32xf32, #tpu.memory_space<vmem>>, vector<1x16xf32>,
    %c0_61 = arith.constant 0 : index
    %c0_62 = arith.constant 0 : index
    %340 = vector.load %arg16[%c0_61, %c0_62] : memref<14x32xf32, #tpu.memory_space<vmem>>, vector<14x32xf32>
    %341 = vector.extract_strided_slice %340 {offsets = [0, 0], sizes = [8, 32], strides = [1, 1]} : vector<14x32xf32> to vector<8x32xf32>
    %342 = vector.extract_strided_slice %340 {offsets = [1, 0], sizes = [8, 32], strides = [1, 1]} : vector<14x32xf32> to vector<8x32xf32>
    %343 = vector.extract_strided_slice %340 {offsets = [2, 0], sizes = [8, 32], strides = [1, 1]} : vector<14x32xf32> to vector<8x32xf32>
    %344 = vector.extract_strided_slice %340 {offsets = [3, 0], sizes = [8, 32], strides = [1, 1]} : vector<14x32xf32> to vector<8x32xf32>
    %345 = vector.extract_strided_slice %340 {offsets = [4, 0], sizes = [8, 32], strides = [1, 1]} : vector<14x32xf32> to vector<8x32xf32>
    %346 = vector.extract_strided_slice %340 {offsets = [5, 0], sizes = [8, 32], strides = [1, 1]} : vector<14x32xf32> to vector<8x32xf32>
    %347 = vector.extract_strided_slice %340 {offsets = [6, 0], sizes = [8, 32], strides = [1, 1]} : vector<14x32xf32> to vector<8x32xf32>
    %348 = tpu.concatenate %341, %342, %343, %344, %345, %346, %347 in 1 : vector<8x32xf32>, vector<8x32xf32>, vector<8x32xf32>, vector<8x32xf32>, vector<8x32xf32>, vector<8x32xf32>, vector<8x32xf32> -> vector<8x224xf32>
    %349 = arith.truncf %348 : vector<8x224xf32> to vector<8x224xbf16>
    %c0_63 = arith.constant 0 : index
    %c0_64 = arith.constant 0 : index
    %350 = vector.load %arg5[%c0_63, %c0_64] : memref<224x48xbf16, #tpu.memory_space<vmem>>, vector<224x48xbf16>
    %cst_65 = arith.constant dense<0.000000e+00> : vector<8x48xf32>
    %351 = tpu.matmul %349, %350, %cst_65 {dimension_numbers = #tpu.dot_dimension_numbers<[1], [0], [0], [1], [0, 0, 1, 1], [], []>} : vector<8x224xbf16>, vector<224x48xbf16>, vector<8x48xf32> -> vector<8x48xf32>
    %c0_66 = arith.constant 0 : index
    %c0_67 = arith.constant 0 : index
    %352 = vector.load %arg6[%c0_66, %c0_67] : memref<1x48xf32, #tpu.memory_space<vmem>>, vector<1x48xf32>
    %353 = vector.broadcast %352 : vector<1x48xf32> to vector<8x48xf32>
    %354 = arith.addf %351, %353 : vector<8x48xf32>
    %cst_68 = arith.constant 0.000000e+00 : f32
    %355 = vector.broadcast %cst_68 : f32 to vector<8x48xf32>
    %356 = arith.maximumf %354, %355 : vector<8x48xf32>
    %c0_69 = arith.constant 0 : index
    %c0_70 = arith.constant 0 : index
    %357 = vector.load %arg17[%c0_69, %c0_70] : memref<8x48xf32, #tpu.memory_space<vmem>>, vector<8x48xf32>
    tpu.vector_store %arg17[%c0_69, %c0_70], %356 {strides = array<i32>} : memref<8x48xf32, #tpu.memory_space<vmem>>, vector<8x48xf32>,
    %c0_71 = arith.constant 0 : index
    %c0_72 = arith.constant 0 : index
    %358 = tpu.strided_load %arg17[%c0_71, %c0_72] {strides = array<i32: 2, 1>} : memref<8x48xf32, #tpu.memory_space<vmem>>, vector<4x48xf32>
    %c1 = arith.constant 1 : index
    %c0_73 = arith.constant 0 : index
    %359 = tpu.strided_load %arg17[%c1, %c0_73] {strides = array<i32: 2, 1>} : memref<8x48xf32, #tpu.memory_space<vmem>>, vector<4x48xf32>
    %360 = arith.maximumf %358, %359 : vector<4x48xf32>
    %cst_74 = arith.constant 0.000000e+00 : f32
    %361 = vector.broadcast %cst_74 : f32 to vector<1x48xf32>
    %362 = tpu.concatenate %361, %360, %361 in 0 : vector<1x48xf32>, vector<4x48xf32>, vector<1x48xf32> -> vector<6x48xf32>
    %363 = arith.truncf %362 : vector<6x48xf32> to vector<6x48xbf16>
    %cst_75 = arith.constant 0.000000e+00 : f32
    %364 = vector.broadcast %cst_75 : f32 to vector<4x128xf32>
    %365 = vector.extract_strided_slice %363 {offsets = [0, 0], sizes = [4, 48], strides = [1, 1]} : vector<6x48xbf16> to vector<4x48xbf16>
    %c0_76 = arith.constant 0 : index
    %c0_77 = arith.constant 0 : index
    %c0_78 = arith.constant 0 : index
    %366 = vector.load %arg7[%c0_76, %c0_77, %c0_78] : memref<3x48x128xbf16, #tpu.memory_space<vmem>>, vector<1x48x128xbf16>
    %367 = vector.shape_cast %366 : vector<1x48x128xbf16> to vector<48x128xbf16>
    %cst_79 = arith.constant dense<0.000000e+00> : vector<4x128xf32>
    %368 = tpu.matmul %365, %367, %cst_79 {dimension_numbers = #tpu.dot_dimension_numbers<[1], [0], [0], [1], [0, 0, 1, 1], [], []>} : vector<4x48xbf16>, vector<48x128xbf16>, vector<4x128xf32> -> vector<4x128xf32>
    %369 = arith.addf %364, %368 : vector<4x128xf32>
    %370 = vector.extract_strided_slice %363 {offsets = [1, 0], sizes = [4, 48], strides = [1, 1]} : vector<6x48xbf16> to vector<4x48xbf16>
    %c1_80 = arith.constant 1 : index
    %c0_81 = arith.constant 0 : index
    %c0_82 = arith.constant 0 : index
    %371 = vector.load %arg7[%c1_80, %c0_81, %c0_82] : memref<3x48x128xbf16, #tpu.memory_space<vmem>>, vector<1x48x128xbf16>
    %372 = vector.shape_cast %371 : vector<1x48x128xbf16> to vector<48x128xbf16>
    %cst_83 = arith.constant dense<0.000000e+00> : vector<4x128xf32>
    %373 = tpu.matmul %370, %372, %cst_83 {dimension_numbers = #tpu.dot_dimension_numbers<[1], [0], [0], [1], [0, 0, 1, 1], [], []>} : vector<4x48xbf16>, vector<48x128xbf16>, vector<4x128xf32> -> vector<4x128xf32>
    %374 = arith.addf %369, %373 : vector<4x128xf32>
    %375 = vector.extract_strided_slice %363 {offsets = [2, 0], sizes = [4, 48], strides = [1, 1]} : vector<6x48xbf16> to vector<4x48xbf16>
    %c2 = arith.constant 2 : index
    %c0_84 = arith.constant 0 : index
    %c0_85 = arith.constant 0 : index
    %376 = vector.load %arg7[%c2, %c0_84, %c0_85] : memref<3x48x128xbf16, #tpu.memory_space<vmem>>, vector<1x48x128xbf16>
    %377 = vector.shape_cast %376 : vector<1x48x128xbf16> to vector<48x128xbf16>
    %cst_86 = arith.constant dense<0.000000e+00> : vector<4x128xf32>
    %378 = tpu.matmul %375, %377, %cst_86 {dimension_numbers = #tpu.dot_dimension_numbers<[1], [0], [0], [1], [0, 0, 1, 1], [], []>} : vector<4x48xbf16>, vector<48x128xbf16>, vector<4x128xf32> -> vector<4x128xf32>
    %379 = arith.addf %374, %378 : vector<4x128xf32>
    %c0_87 = arith.constant 0 : index
    %c0_88 = arith.constant 0 : index
    %380 = vector.load %arg8[%c0_87, %c0_88] : memref<1x128xf32, #tpu.memory_space<vmem>>, vector<1x128xf32>
    %381 = vector.broadcast %380 : vector<1x128xf32> to vector<4x128xf32>
    %382 = arith.addf %379, %381 : vector<4x128xf32>
    %cst_89 = arith.constant 0.000000e+00 : f32
    %383 = vector.broadcast %cst_89 : f32 to vector<4x128xf32>
    %384 = arith.maximumf %382, %383 : vector<4x128xf32>
    %c0_90 = arith.constant 0 : index
    %c0_91 = arith.constant 0 : index
    %385 = vector.load %arg18[%c0_90, %c0_91] : memref<4x128xf32, #tpu.memory_space<vmem>>, vector<4x128xf32>
    tpu.vector_store %arg18[%c0_90, %c0_91], %384 {strides = array<i32>} : memref<4x128xf32, #tpu.memory_space<vmem>>, vector<4x128xf32>,
    %c0_92 = arith.constant 0 : index
    %c0_93 = arith.constant 0 : index
    %386 = tpu.strided_load %arg18[%c0_92, %c0_93] {strides = array<i32: 2, 1>} : memref<4x128xf32, #tpu.memory_space<vmem>>, vector<2x128xf32>
    %c1_94 = arith.constant 1 : index
    %c0_95 = arith.constant 0 : index
    %387 = tpu.strided_load %arg18[%c1_94, %c0_95] {strides = array<i32: 2, 1>} : memref<4x128xf32, #tpu.memory_space<vmem>>, vector<2x128xf32>
    %388 = arith.maximumf %386, %387 : vector<2x128xf32>
    %389 = vector.extract_strided_slice %388 {offsets = [0, 0], sizes = [2, 120], strides = [1, 1]} : vector<2x128xf32> to vector<2x120xf32>
    %390 = vector.extract_strided_slice %388 {offsets = [0, 8], sizes = [2, 120], strides = [1, 1]} : vector<2x128xf32> to vector<2x120xf32>
    %391 = arith.maximumf %389, %390 : vector<2x120xf32>
    %cst_96 = arith.constant 0.000000e+00 : f32
    %392 = vector.broadcast %cst_96 : f32 to vector<1x120xf32>
    %393 = tpu.concatenate %392, %391, %392 in 0 : vector<1x120xf32>, vector<2x120xf32>, vector<1x120xf32> -> vector<4x120xf32>
    %394 = arith.truncf %393 : vector<4x120xf32> to vector<4x120xbf16>
    %cst_97 = arith.constant 0.000000e+00 : f32
    %395 = vector.broadcast %cst_97 : f32 to vector<2x64xf32>
    %396 = vector.extract_strided_slice %394 {offsets = [0, 0], sizes = [2, 120], strides = [1, 1]} : vector<4x120xbf16> to vector<2x120xbf16>
    %c0_98 = arith.constant 0 : index
    %c0_99 = arith.constant 0 : index
    %c0_100 = arith.constant 0 : index
    %397 = vector.load %arg9[%c0_98, %c0_99, %c0_100] : memref<3x120x64xbf16, #tpu.memory_space<vmem>>, vector<1x120x64xbf16>
    %398 = vector.shape_cast %397 : vector<1x120x64xbf16> to vector<120x64xbf16>
    %cst_101 = arith.constant dense<0.000000e+00> : vector<2x64xf32>
    %399 = tpu.matmul %396, %398, %cst_101 {dimension_numbers = #tpu.dot_dimension_numbers<[1], [0], [0], [1], [0, 0, 1, 1], [], []>} : vector<2x120xbf16>, vector<120x64xbf16>, vector<2x64xf32> -> vector<2x64xf32>
    %400 = arith.addf %395, %399 : vector<2x64xf32>
    %401 = vector.extract_strided_slice %394 {offsets = [1, 0], sizes = [2, 120], strides = [1, 1]} : vector<4x120xbf16> to vector<2x120xbf16>
    %c1_102 = arith.constant 1 : index
    %c0_103 = arith.constant 0 : index
    %c0_104 = arith.constant 0 : index
    %402 = vector.load %arg9[%c1_102, %c0_103, %c0_104] : memref<3x120x64xbf16, #tpu.memory_space<vmem>>, vector<1x120x64xbf16>
    %403 = vector.shape_cast %402 : vector<1x120x64xbf16> to vector<120x64xbf16>
    %cst_105 = arith.constant dense<0.000000e+00> : vector<2x64xf32>
    %404 = tpu.matmul %401, %403, %cst_105 {dimension_numbers = #tpu.dot_dimension_numbers<[1], [0], [0], [1], [0, 0, 1, 1], [], []>} : vector<2x120xbf16>, vector<120x64xbf16>, vector<2x64xf32> -> vector<2x64xf32>
    %405 = arith.addf %400, %404 : vector<2x64xf32>
    %406 = vector.extract_strided_slice %394 {offsets = [2, 0], sizes = [2, 120], strides = [1, 1]} : vector<4x120xbf16> to vector<2x120xbf16>
    %c2_106 = arith.constant 2 : index
    %c0_107 = arith.constant 0 : index
    %c0_108 = arith.constant 0 : index
    %407 = vector.load %arg9[%c2_106, %c0_107, %c0_108] : memref<3x120x64xbf16, #tpu.memory_space<vmem>>, vector<1x120x64xbf16>
    %408 = vector.shape_cast %407 : vector<1x120x64xbf16> to vector<120x64xbf16>
    %cst_109 = arith.constant dense<0.000000e+00> : vector<2x64xf32>
    %409 = tpu.matmul %406, %408, %cst_109 {dimension_numbers = #tpu.dot_dimension_numbers<[1], [0], [0], [1], [0, 0, 1, 1], [], []>} : vector<2x120xbf16>, vector<120x64xbf16>, vector<2x64xf32> -> vector<2x64xf32>
    %410 = arith.addf %405, %409 : vector<2x64xf32>
    %c0_110 = arith.constant 0 : index
    %c0_111 = arith.constant 0 : index
    %411 = vector.load %arg10[%c0_110, %c0_111] : memref<1x64xf32, #tpu.memory_space<vmem>>, vector<1x64xf32>
    %412 = vector.broadcast %411 : vector<1x64xf32> to vector<2x64xf32>
    %413 = arith.addf %410, %412 : vector<2x64xf32>
    %414 = vector.extract_strided_slice %413 {offsets = [0, 0], sizes = [1, 64], strides = [1, 1]} : vector<2x64xf32> to vector<1x64xf32>
    %415 = vector.extract_strided_slice %413 {offsets = [1, 0], sizes = [1, 64], strides = [1, 1]} : vector<2x64xf32> to vector<1x64xf32>
    %416 = arith.maximumf %414, %415 : vector<1x64xf32>
    %417 = vector.extract_strided_slice %416 {offsets = [0, 0], sizes = [1, 56], strides = [1, 1]} : vector<1x64xf32> to vector<1x56xf32>
    %418 = vector.extract_strided_slice %416 {offsets = [0, 8], sizes = [1, 56], strides = [1, 1]} : vector<1x64xf32> to vector<1x56xf32>
    %419 = arith.maximumf %417, %418 : vector<1x56xf32>
    %420 = arith.truncf %419 : vector<1x56xf32> to vector<1x56xbf16>
    %c0_112 = arith.constant 0 : index
    %c0_113 = arith.constant 0 : index
    %421 = vector.load %arg11[%c0_112, %c0_113] : memref<56x64xbf16, #tpu.memory_space<vmem>>, vector<56x64xbf16>
    %cst_114 = arith.constant dense<0.000000e+00> : vector<1x64xf32>
    %422 = tpu.matmul %420, %421, %cst_114 {dimension_numbers = #tpu.dot_dimension_numbers<[1], [0], [0], [1], [0, 0, 1, 1], [], []>} : vector<1x56xbf16>, vector<56x64xbf16>, vector<1x64xf32> -> vector<1x64xf32>
    %c0_115 = arith.constant 0 : index
    %c0_116 = arith.constant 0 : index
    %423 = vector.load %arg12[%c0_115, %c0_116] : memref<1x64xf32, #tpu.memory_space<vmem>>, vector<1x64xf32>
    %424 = arith.addf %422, %423 : vector<1x64xf32>
    %425 = arith.truncf %424 : vector<1x64xf32> to vector<1x64xbf16>
    %c0_117 = arith.constant 0 : index
    %c0_118 = arith.constant 0 : index
    %426 = vector.load %arg13[%c0_117, %c0_118] : memref<64x1xbf16, #tpu.memory_space<vmem>>, vector<64x1xbf16>
    %cst_119 = arith.constant dense<0.000000e+00> : vector<1x1xf32>
    %427 = tpu.matmul %425, %426, %cst_119 {dimension_numbers = #tpu.dot_dimension_numbers<[1], [0], [0], [1], [0, 0, 1, 1], [], []>} : vector<1x64xbf16>, vector<64x1xbf16>, vector<1x1xf32> -> vector<1x1xf32>
    %c0_120 = arith.constant 0 : index
    %c0_121 = arith.constant 0 : index
    %428 = vector.load %arg14[%c0_120, %c0_121] : memref<1x1xf32, #tpu.memory_space<vmem>>, vector<1x1xf32>
    %429 = arith.addf %427, %428 : vector<1x1xf32>
    %430 = arith.negf %429 : vector<1x1xf32>
    %431 = math.exp %430 : vector<1x1xf32>
    %cst_122 = arith.constant 1.000000e+00 : f32
    %432 = vector.broadcast %cst_122 : f32 to vector<1x1xf32>
    %433 = arith.addf %432, %431 : vector<1x1xf32>
    %434 = arith.divf %432, %433 : vector<1x1xf32>
    %c0_123 = arith.constant 0 : index
    %c0_124 = arith.constant 0 : index
    %c0_125 = arith.constant 0 : index
    %435 = vector.load %arg15[%c0_123, %c0_124, %c0_125] : memref<1x1x1xf32, #tpu.memory_space<vmem>>, vector<1x1x1xf32>
    %436 = vector.shape_cast %435 : vector<1x1x1xf32> to vector<1x1xf32>
    %437 = vector.shape_cast %434 : vector<1x1xf32> to vector<1x1x1xf32>
    tpu.vector_store %arg15[%c0_123, %c0_124, %c0_125], %437 {strides = array<i32>} : memref<1x1x1xf32, #tpu.memory_space<vmem>>, vector<1x1x1xf32>,
    return
  }
  func.func @transform_0(%arg0: i32) -> (i32, i32, i32) {
    %c0_i32 = arith.constant 0 : i32
    %c0_i32_0 = arith.constant 0 : i32
    %c0_i32_1 = arith.constant 0 : i32
    return %arg0, %c0_i32, %c0_i32_0 : i32, i32, i32
  }
  func.func @transform_1(%arg0: i32) -> (i32, i32) {
    %c0_i32 = arith.constant 0 : i32
    %c0_i32_0 = arith.constant 0 : i32
    %c0_i32_1 = arith.constant 0 : i32
    return %c0_i32, %c0_i32_0 : i32, i32
  }
  func.func @transform_2(%arg0: i32) -> (i32, i32) {
    %c0_i32 = arith.constant 0 : i32
    %c0_i32_0 = arith.constant 0 : i32
    %c0_i32_1 = arith.constant 0 : i32
    return %c0_i32, %c0_i32_0 : i32, i32
  }
  func.func @transform_3(%arg0: i32) -> (i32, i32) {
    %c0_i32 = arith.constant 0 : i32
    %c0_i32_0 = arith.constant 0 : i32
    %c0_i32_1 = arith.constant 0 : i32
    return %c0_i32, %c0_i32_0 : i32, i32
  }
  func.func @transform_4(%arg0: i32) -> (i32, i32) {
    %c0_i32 = arith.constant 0 : i32
    %c0_i32_0 = arith.constant 0 : i32
    %c0_i32_1 = arith.constant 0 : i32
    return %c0_i32, %c0_i32_0 : i32, i32
  }
  func.func @transform_5(%arg0: i32) -> (i32, i32) {
    %c0_i32 = arith.constant 0 : i32
    %c0_i32_0 = arith.constant 0 : i32
    %c0_i32_1 = arith.constant 0 : i32
    return %c0_i32, %c0_i32_0 : i32, i32
  }
  func.func @transform_6(%arg0: i32) -> (i32, i32, i32) {
    %c0_i32 = arith.constant 0 : i32
    %c0_i32_0 = arith.constant 0 : i32
    %c0_i32_1 = arith.constant 0 : i32
    %c0_i32_2 = arith.constant 0 : i32
    return %c0_i32, %c0_i32_0, %c0_i32_1 : i32, i32, i32
  }
  func.func @transform_7(%arg0: i32) -> (i32, i32) {
    %c0_i32 = arith.constant 0 : i32
    %c0_i32_0 = arith.constant 0 : i32
    %c0_i32_1 = arith.constant 0 : i32
    return %c0_i32, %c0_i32_0 : i32, i32
  }
  func.func @transform_8(%arg0: i32) -> (i32, i32, i32) {
    %c0_i32 = arith.constant 0 : i32
    %c0_i32_0 = arith.constant 0 : i32
    %c0_i32_1 = arith.constant 0 : i32
    %c0_i32_2 = arith.constant 0 : i32
    return %c0_i32, %c0_i32_0, %c0_i32_1 : i32, i32, i32
  }
  func.func @transform_9(%arg0: i32) -> (i32, i32) {
    %c0_i32 = arith.constant 0 : i32
    %c0_i32_0 = arith.constant 0 : i32
    %c0_i32_1 = arith.constant 0 : i32
    return %c0_i32, %c0_i32_0 : i32, i32
  }
  func.func @transform_10(%arg0: i32) -> (i32, i32) {
    %c0_i32 = arith.constant 0 : i32
    %c0_i32_0 = arith.constant 0 : i32
    %c0_i32_1 = arith.constant 0 : i32
    return %c0_i32, %c0_i32_0 : i32, i32
  }
  func.func @transform_11(%arg0: i32) -> (i32, i32) {
    %c0_i32 = arith.constant 0 : i32
    %c0_i32_0 = arith.constant 0 : i32
    %c0_i32_1 = arith.constant 0 : i32
    return %c0_i32, %c0_i32_0 : i32, i32
  }
  func.func @transform_12(%arg0: i32) -> (i32, i32) {
    %c0_i32 = arith.constant 0 : i32
    %c0_i32_0 = arith.constant 0 : i32
    %c0_i32_1 = arith.constant 0 : i32
    return %c0_i32, %c0_i32_0 : i32, i32
  }
  func.func @transform_13(%arg0: i32) -> (i32, i32) {
    %c0_i32 = arith.constant 0 : i32
    %c0_i32_0 = arith.constant 0 : i32
    %c0_i32_1 = arith.constant 0 : i32
    return %c0_i32, %c0_i32_0 : i32, i32
  }
  func.func @transform_14(%arg0: i32) -> (i32, i32, i32) {
    %c0_i32 = arith.constant 0 : i32
    %c0_i32_0 = arith.constant 0 : i32
    %c0_i32_1 = arith.constant 0 : i32
    return %arg0, %c0_i32, %c0_i32_0 : i32, i32, i32
  }
}

</mosaic_0001>

<bundles_post_ra>
// kernel: model_forward.1
= control target key start
LH: loop header
LB: loop body
LE: loop exit
PB: predicated region body
PF: predicated region fallthrough
CT: control target
= control target key end

     0   :  { %s2475_s15 = smov 0   ;;  %s2817_s0 = inlined_call_operand.vmem [shape: bf16[2,8,32], index: 0, kind: input, shape index: {}]   ;;  %s2818_s1 = inlined_call_operand.vmem [shape: bf16[32,128], index: 1, kind: input, shape index: {}]   ;;  %s2819_s2 = inlined_call_operand.vmem [shape: f32[1,128], index: 2, kind: input, shape index: {}]   ;;  %s2820_s3 = inlined_call_operand.vmem [shape: bf16[32,128], index: 3, kind: input, shape index: {}]   ;;  %s2821_s4 = inlined_call_operand.vmem [shape: bf16[224,48], index: 4, kind: input, shape index: {}]   ;;  %s2822_s5 = inlined_call_operand.vmem [shape: f32[1,48], index: 5, kind: input, shape index: {}]   ;;  %s2823_s6 = inlined_call_operand.vmem [shape: bf16[3,48,128], index: 6, kind: input, shape index: {}]   ;;  %s2824_s7 = inlined_call_operand.vmem [shape: f32[1,128], index: 7, kind: input, shape index: {}]   ;;  %s2825_s8 = inlined_call_operand.vmem [shape: bf16[3,120,64], index: 8, kind: input, shape index: {}]   ;;  %s2826_s9 = inlined_call_operand.vmem [shape: f32[1,64], index: 9, kind: input, shape index: {}]   ;;  %s2827_s10 = inlined_call_operand.vmem [shape: bf16[56,64], index: 10, kind: input, shape index: {}]   ;;  %s2828_s11 = inlined_call_operand.vmem [shape: f32[1,64], index: 11, kind: input, shape index: {}]   ;;  %s2829_s12 = inlined_call_operand.vmem [shape: bf16[64,1], index: 12, kind: input, shape index: {}]   ;;  %s2830_s13 = inlined_call_operand.<no memory space> [shape: f32[1,1], index: 13, kind: input, shape index: {}]   ;;  %s2831_s14 = inlined_call_operand.vmem [shape: f32[2,1,1], index: 14, kind: output, shape index: {}]  }
   0x1   :  { %v19_v0 = vstv %s2830_s13 }
   0x2   :  { %20 = vst [vmem:[#allocation5] sm:$0x1] %v19_v0 }
   0x3 LB: > { %s1930_s16 = sadd.s32 4294967295, %s2386_s15   ;;  %p1934_p0 = scmp.ge.s32.totalorder %s2386_s15, 1  ;;  %s2386_s15 = sphi %s2475_s15, %s26_s15  }
   0x4   : > { %p413_p1 = scmp.lt.s32.totalorder %s2386_s15, 3 }
   0x6   : > { %p414_p2 = pnand %p1934_p0, %p413_p1 }
   0x7   : > { %p456_p3 = scmp.lt.s32.totalorder (!%p414_p2), %s1930_s16, 1  ;;  %s2389_s30 = smov (!%p414_p2), 80  }
   0x8   : > { %417 = sbr.rel (%p414_p2) target bundleno = 5927 (0x1727), region = 76  ;;  %s2390_s17 = smov (!%p414_p2), 16  }
   0x9   : > { %s2392_s18 = smov (!%p414_p2), 48   ;;  %s2393_s13 = smov (!%p414_p2), 96  }
   0xa   : > { %s2394_s19 = smov (!%p414_p2), 64   ;;  %s2395_s20 = smov (!%p414_p2), 32  }
   0xb   : > { %s2396_s26 = smov (!%p414_p2), 120  }
   0xd   : > { %v2227_v1 = vld [vmem:[%s2818_s1 + $0x8] sm:$0xff]  ;;  %v2226_v3 = vld [vmem:[%s2818_s1] sm:$0xff]  ;;  %s2833_s16 = smov (!%p456_p3, %s1930_s16), 1  ;;  %vm485_vm0 = vcmask 261120   ;;  %v2388_v6 = vmov 0   ;;  %vm540_vm1 = vcmask 523264  }
   0xe   : > { %v2229_v2 = vld [vmem:[%s2820_s3 + $0x8] sm:$0xff]  ;;  %495 = vmatpush.bf16.msra.mxu0 %v2227_v1  ;;  %v2228_v4 = vld [vmem:[%s2820_s3] sm:$0xff]  ;;  %s1935_s24 = sshll.u32 %s2833_s16, 2  ;;  %vm507_vm6 = vcmask 259072   ;;  %v2391_v36 = vmov 0.0   ;;  %vm589_vm7 = vcmask 254080   ;;  %s462_s23 = scalar_lea.vmem %s2831_s14, %s2833_s16 }
   0xf   : > { %530 = vmatpush.bf16.msra.mxu1 %v2229_v2  ;;  %603 = vmatpush.bf16.msra.mxu2 %v2229_v2  ;;  %s459_s27 = scalar_lea.vmem %s2817_s0, %s1935_s24  ;;  %v2308_v7 = vld [vmem:[%s2819_s2] ss:$0 sm:$0xff]  ;;  %506 = vst.msk [vmem:[#allocation2] sm:$0xff] %vm485_vm0, %v2391_v36  ;;  %vm584_vm8 = vcmask 122880   ;;  %vm591_vm9 = vcmask 130048   ;;  %vm661_vm14 = vcmask 123905  }
  0x10   : > { %682 = vmatpush.bf16.msra.mxu3 %v2229_v2  ;;  %v464_v5 = vld [vmem:[%s459_s27] sm:$0xf]  ;;  %508 = vst.msk [vmem:[#allocation2 + $0x8] sm:$0x3f] %vm507_vm6, %v2391_v36  ;;  %vm666_vm15 = vcmask 255105   ;;  %vm745_vm6 = vcmask 256130  }
  0x12   : > { %496 = vmatpush.bf16.msra.mxu0 %v2226_v3 }
  0x13   : > { %531 = vmatpush.bf16.msra.mxu1 %v2228_v4  ;;  %604 = vmatpush.bf16.msra.mxu2 %v2228_v4 }
  0x14   : > { %683 = vmatpush.bf16.msra.mxu3 %v2228_v4 }
  0x15   : > { %1944 = vmatmul.msk.bf16.vlgmr.msra.gmra.mxu0 %vm485_vm0, %v464_v5 }
  0x16   : > { %760 = vmatpush.bf16.msrb.mxu0 %v2229_v2  ;;  %532 = vmatmul.bf16.vlgmr.msra.gmra.mxu1 %v2388_v6 }
  0x17   : > { %840 = vmatpush.bf16.msrb.mxu1 %v2229_v2  ;;  %915 = vmatpush.bf16.msrb.mxu2 %v2229_v2 }
  0x18   : > { %992 = vmatpush.bf16.msrb.mxu3 %v2229_v2 }
  0x1a   : > { %761 = vmatpush.bf16.msrb.mxu0 %v2228_v4 }
  0x1b   : > { %841 = vmatpush.bf16.msrb.mxu1 %v2228_v4  ;;  %916 = vmatpush.bf16.msrb.mxu2 %v2228_v4 }
  0x1c   : > { %993 = vmatpush.bf16.msrb.mxu3 %v2228_v4 }
  0x1e   : > { %1067 = vmatpush.bf16.msra.mxu0 %v2229_v2 }
  0x22   : > { %1068 = vmatpush.bf16.msra.mxu0 %v2228_v4 }
  0x92   : > { %v498_v8 = vpop.f32.mrf.mxu0 }
  0x93   : > { %v533_v9 = vpop.f32.mrf.mxu1  ;;  %v2505_v10 = vadd.f32 %v2308_v7, %v498_v8 }
  0x95   : > { %v538_v11 = vrot.slane %v2505_v10, 7  ;;  %v610_v43 = vrot.slane %v2505_v10, 5 }
  0x97   : > { %v2510_v12 = vsel %vm540_vm1, %v2505_v10, %v538_v11  ;;  %v2524_v46 = vsel %vm540_vm1, %v2505_v10, %v610_v43 }
  0x98   : > { %v542_v13 = vadd.f32 %v2510_v12, %v533_v9 }
  0x9a   : > { %2312 = vtanh.f32 %v542_v13  ;;  %v500_v14 = vpop.f32.mrf.mxu0  ;;  %v1953_v17 = vmul.f32 -1.442695, %v542_v13 }
  0x9b   : > { %v535_v15 = vpop.f32.mrf.mxu1 }
  0x9c   : > { %2314 = vpow2.f32 %v1953_v17  ;;  %v689_v15 = vrot.slane %v2505_v10, 3 }
  0xa0   : > { %v2313_v16 = vpop.eup %2312 }
  0xa1   : > { %565 = vrot.lane.b32.xlu0 %v2313_v16, %s2389_s30 }
  0xa2   : > { %v2315_v18 = vpop.eup %2314 }
  0xa3   : > { %v546_v19 = vadd.f32 1.0, %v2315_v18  ;;  %v2537_v18 = vsel %vm540_vm1, %v2505_v10, %v689_v15 }
  0xa5   : > { %2316 = vrcp.f32 %v546_v19  ;;  %v558_v25 = vand.u32 2147483648, %v546_v19  ;;  %vm552_vm3 = vweird.f32 %v546_v19  ;;  %v556_v26 = vand.u32 2147483647, %v546_v19 }
  0xa7   : > { %v559_v28 = vor.u32 1.1754944e-38, %v558_v25  ;;  %vm557_vm5 = vcmp.eq.f32.partialorder %v556_v26, 8.507059e+37 }
  0xab   : > { %v2317_v20 = vpop.eup %2316 }
  0xac   : > { %v548_v21 = vmul.f32 %v2317_v20, %v546_v19  ;;  %vm553_vm2 = vweird.f32 %v2317_v20 }
  0xad   : > { %vm554_vm4 = vmor %vm552_vm3, %vm553_vm2 }
  0xae   : > { %v549_v22 = vsub.f32 1.0, %v548_v21 }
  0xb0   : > { %v550_v23 = vmul.f32 %v2317_v20, %v549_v22 }
  0xb2   : > { %v551_v24 = vadd.f32 %v2317_v20, %v550_v23 }
  0xb4   : > { %v555_v27 = vsel %vm554_vm4, %v2317_v20, %v551_v24 }
  0xb5   : > { %v560_v30 = vsel %vm557_vm5, %v559_v28, %v555_v27 }
  0xb6   : > { %v563_v32 = vmul.f32 0.0, %v560_v30 }
 0x113   : > { %v566_v29 = vpop.permute.xlu0 %565 }
 0x114   : > { %v568_v31 = vmul.f32 %v566_v29, %v560_v30 }
 0x116   : > { %570 = vrot.lane.b32.xlu0 %v568_v31, %s2390_s17 }
 0x188   : > { %v571_v33 = vpop.permute.xlu0 %570 }
 0x189   : > { %v573_v34 = vadd.f32 %v571_v33, %v563_v32 }
 0x18b   : > { %2318 = vtanh.f32 %v573_v34  ;;  %v638_v1 = vrot.slane %v573_v34, 7 }
 0x191   : > { %v2319_v35 = vpop.eup %2318 }
 0x192   : > { %576 = vrot.lane.b32.xlu1 %v2319_v35, %s2390_s17 }
 0x204   : > { %v577_v37 = vpop.permute.xlu1 %576 }
 0x205   : > { %v579_v38 = vmul.f32 %v577_v37, %v560_v30 }
 0x207   : > { %586 = vrot.lane.b32.xlu2 %v579_v38, %s2392_s18  ;;  %581 = vrot.lane.b32.xlu1 %v579_v38, %s2393_s13 }
 0x261   : > { %v587_v39 = vpop.permute.xlu2 %586 }
 0x262   : > { %590 = vst.msk [vmem:[#allocation2 + $0xa] sm:$0x1] %vm589_vm7, %v587_v39  ;;  %vm740_vm7 = vcmask 124930  }
 0x279   : > { %v582_v40 = vpop.permute.xlu1 %581 }
 0x27a   : > { %585 = vst.msk [vmem:[#allocation2 + $0x3] sm:$0x1] %vm584_vm8, %v582_v40  ;;  %v592_v41 = vsel %vm591_vm9, %v582_v40, %v587_v39 }
 0x27b   : > { %v593_v42 = vpack.c.bf16 %v592_v41, %v592_v41 }
 0x27d   : > { %1954 = vmatmul.msk.bf16.vlgmr.msra.gmra.mxu2 %vm485_vm0, %v593_v42 }
 0x300   : > { %v606_v44 = vpop.f32.mrf.mxu2 }
 0x301   : > { %v614_v45 = vrot.slane %v606_v44, 7 }
 0x303   : > { %v616_v47 = vadd.f32 %v614_v45, %v2524_v46 }
 0x305   : > { %2320 = vtanh.f32 %v616_v47  ;;  %v1955_v50 = vmul.f32 -1.442695, %v616_v47 }
 0x307   : > { %2322 = vpow2.f32 %v1955_v50  ;;  %v767_v50 = vrot.slane %v2505_v10, 1 }
 0x308   : > { %v608_v48 = vpop.f32.mrf.mxu2 }
 0x30b   : > { %v2321_v49 = vpop.eup %2320 }
 0x30c   : > { %642 = vrot.lane.b32.xlu2 %v2321_v49, %s2389_s30 }
 0x30d   : > { %v2323_v51 = vpop.eup %2322 }
 0x30e   : > { %v620_v52 = vadd.f32 1.0, %v2323_v51 }
 0x310   : > { %2324 = vrcp.f32 %v620_v52  ;;  %v632_v58 = vand.u32 2147483648, %v620_v52  ;;  %vm626_vm11 = vweird.f32 %v620_v52  ;;  %v630_v59 = vand.u32 2147483647, %v620_v52 }
 0x312   : > { %v633_v61 = vor.u32 1.1754944e-38, %v632_v58  ;;  %vm631_vm13 = vcmp.eq.f32.partialorder %v630_v59, 8.507059e+37 }
 0x316   : > { %v2325_v53 = vpop.eup %2324 }
 0x317   : > { %v622_v54 = vmul.f32 %v2325_v53, %v620_v52  ;;  %vm627_vm10 = vweird.f32 %v2325_v53 }
 0x318   : > { %vm628_vm12 = vmor %vm626_vm11, %vm627_vm10 }
 0x319   : > { %v623_v55 = vsub.f32 1.0, %v622_v54 }
 0x31b   : > { %v624_v56 = vmul.f32 %v2325_v53, %v623_v55 }
 0x31d   : > { %v625_v57 = vadd.f32 %v2325_v53, %v624_v56 }
 0x31f   : > { %v629_v60 = vsel %vm628_vm12, %v2325_v53, %v625_v57  ;;  %v2550_v53 = vsel %vm540_vm1, %v2505_v10, %v767_v50 }
 0x320   : > { %v634_v63 = vsel %vm631_vm13, %v633_v61, %v629_v60  ;;  %vm823_vm13 = vcmask 257155  }
 0x321   : > { %v640_v2 = vmul.f32 %v638_v1, %v634_v63 }
 0x366   : > { %v643_v62 = vpop.permute.xlu2 %642 }
 0x367   : > { %v645_v0 = vmul.f32 %v643_v62, %v634_v63 }
 0x369   : > { %647 = vrot.lane.b32.xlu0 %v645_v0, %s2390_s17 }
 0x3db   : > { %v648_v3 = vpop.permute.xlu0 %647 }
 0x3dc   : > { %v650_v4 = vadd.f32 %v648_v3, %v640_v2 }
 0x3de   : > { %2326 = vtanh.f32 %v650_v4  ;;  %v717_v37 = vrot.slane %v650_v4, 7 }
 0x3e4   : > { %v2327_v5 = vpop.eup %2326 }
 0x3e5   : > { %653 = vrot.lane.b32.xlu1 %v2327_v5, %s2390_s17 }
 0x457   : > { %v654_v6 = vpop.permute.xlu1 %653 }
 0x458   : > { %v656_v7 = vmul.f32 %v654_v6, %v634_v63 }
 0x45a   : > { %663 = vrot.lane.b32.xlu0 %v656_v7, %s2392_s18  ;;  %658 = vrot.lane.b32.xlu2 %v656_v7, %s2393_s13 }
 0x4b4   : > { %v659_v8 = vpop.permute.xlu2 %658 }
 0x4b5   : > { %662 = vst.msk [vmem:[#allocation2 + $0x3] sm:$0x2] %vm661_vm14, %v659_v8  ;;  %vm818_vm14 = vcmask 125955  }
 0x4cc   : > { %v664_v9 = vpop.permute.xlu0 %663 }
 0x4cd   : > { %667 = vst.msk [vmem:[#allocation2 + $0x8] sm:$0x2] %vm666_vm15, %v664_v9  ;;  %v668_v11 = vsel %vm591_vm9, %v659_v8, %v664_v9 }
 0x4ce   : > { %v669_v13 = vpack.c.bf16 %v668_v11, %v668_v11 }
 0x4d0   : > { %v671_v14 = vshrl.u32 %v669_v13, 16 }
 0x4d2   : > { %1956 = vmatmul.msk.bf16.vlgmr.msra.gmra.mxu3 %vm485_vm0, %v671_v14 }
 0x555   : > { %v685_v16 = vpop.f32.mrf.mxu3 }
 0x556   : > { %v693_v17 = vrot.slane %v685_v16, 6 }
 0x558   : > { %v695_v19 = vadd.f32 %v693_v17, %v2537_v18 }
 0x55a   : > { %2328 = vtanh.f32 %v695_v19  ;;  %v1957_v22 = vmul.f32 -1.442695, %v695_v19 }
 0x55c   : > { %2330 = vpow2.f32 %v1957_v22 }
 0x55d   : > { %v687_v20 = vpop.f32.mrf.mxu3 }
 0x560   : > { %v2329_v21 = vpop.eup %2328 }
 0x561   : > { %721 = vrot.lane.b32.xlu1 %v2329_v21, %s2389_s30 }
 0x562   : > { %v2331_v23 = vpop.eup %2330 }
 0x563   : > { %v699_v24 = vadd.f32 1.0, %v2331_v23 }
 0x565   : > { %2332 = vrcp.f32 %v699_v24  ;;  %v711_v30 = vand.u32 2147483648, %v699_v24  ;;  %vm705_vm3 = vweird.f32 %v699_v24  ;;  %v709_v31 = vand.u32 2147483647, %v699_v24 }
 0x567   : > { %v712_v33 = vor.u32 1.1754944e-38, %v711_v30  ;;  %vm710_vm5 = vcmp.eq.f32.partialorder %v709_v31, 8.507059e+37 }
 0x56b   : > { %v2333_v25 = vpop.eup %2332 }
 0x56c   : > { %v701_v26 = vmul.f32 %v2333_v25, %v699_v24  ;;  %vm706_vm2 = vweird.f32 %v2333_v25 }
 0x56d   : > { %vm707_vm4 = vmor %vm705_vm3, %vm706_vm2 }
 0x56e   : > { %v702_v27 = vsub.f32 1.0, %v701_v26 }
 0x570   : > { %v703_v28 = vmul.f32 %v2333_v25, %v702_v27 }
 0x572   : > { %v704_v29 = vadd.f32 %v2333_v25, %v703_v28 }
 0x574   : > { %v708_v32 = vsel %vm707_vm4, %v2333_v25, %v704_v29 }
 0x575   : > { %v713_v35 = vsel %vm710_vm5, %v712_v33, %v708_v32  ;;  %vm895_vm5 = vcmask 126980  }
 0x576   : > { %v719_v38 = vmul.f32 %v717_v37, %v713_v35 }
 0x5d3   : > { %v722_v34 = vpop.permute.xlu1 %721 }
 0x5d4   : > { %v724_v36 = vmul.f32 %v722_v34, %v713_v35 }
 0x5d6   : > { %726 = vrot.lane.b32.xlu2 %v724_v36, %s2390_s17 }
 0x630   : > { %v727_v39 = vpop.permute.xlu2 %726 }
 0x631   : > { %v729_v40 = vadd.f32 %v727_v39, %v719_v38 }
 0x633   : > { %2334 = vtanh.f32 %v729_v40  ;;  %v795_v7 = vrot.slane %v729_v40, 7 }
 0x639   : > { %v2335_v41 = vpop.eup %2334 }
 0x63a   : > { %732 = vrot.lane.b32.xlu0 %v2335_v41, %s2390_s17 }
 0x6ac   : > { %v733_v42 = vpop.permute.xlu0 %732 }
 0x6ad   : > { %v735_v43 = vmul.f32 %v733_v42, %v713_v35 }
 0x6af   : > { %742 = vrot.lane.b32.xlu2 %v735_v43, %s2392_s18  ;;  %737 = vrot.lane.b32.xlu1 %v735_v43, %s2393_s13 }
 0x709   : > { %v743_v44 = vpop.permute.xlu2 %742 }
 0x70a   : > { %746 = vst.msk [vmem:[#allocation2 + $0x6] sm:$0x4] %vm745_vm6, %v743_v44  ;;  %vm900_vm6 = vcmask 258180  }
 0x721   : > { %v738_v45 = vpop.permute.xlu1 %737 }
 0x722   : > { %741 = vst.msk [vmem:[#allocation2 + $0x3] sm:$0x4] %vm740_vm7, %v738_v45  ;;  %v747_v47 = vsel %vm591_vm9, %v738_v45, %v743_v44 }
 0x723   : > { %v748_v48 = vpack.c.bf16 %v747_v47, %v747_v47 }
 0x725   : > { %v750_v49 = vrot.slane %v748_v48, 1 }
 0x727   : > { %1958 = vmatmul.msk.bf16.vlgmr.msrb.gmra.mxu0 %vm485_vm0, %v750_v49 }
 0x7a4   : > { %v763_v51 = vpop.f32.mrf.mxu0 }
 0x7a5   : > { %v771_v52 = vrot.slane %v763_v51, 5 }
 0x7a7   : > { %v773_v54 = vadd.f32 %v771_v52, %v2550_v53 }
 0x7a9   : > { %2336 = vtanh.f32 %v773_v54  ;;  %v1959_v57 = vmul.f32 -1.442695, %v773_v54 }
 0x7ab   : > { %2338 = vpow2.f32 %v1959_v57 }
 0x7ac   : > { %v765_v55 = vpop.f32.mrf.mxu0 }
 0x7af   : > { %v2337_v56 = vpop.eup %2336 }
 0x7b0   : > { %799 = vrot.lane.b32.xlu0 %v2337_v56, %s2389_s30 }
 0x7b1   : > { %v2339_v58 = vpop.eup %2338 }
 0x7b2   : > { %v777_v59 = vadd.f32 1.0, %v2339_v58 }
 0x7b4   : > { %2340 = vrcp.f32 %v777_v59  ;;  %v789_v10 = vand.u32 2147483648, %v777_v59  ;;  %vm783_vm10 = vweird.f32 %v777_v59  ;;  %v787_v1 = vand.u32 2147483647, %v777_v59 }
 0x7b6   : > { %v790_v3 = vor.u32 1.1754944e-38, %v789_v10  ;;  %vm788_vm12 = vcmp.eq.f32.partialorder %v787_v1, 8.507059e+37 }
 0x7ba   : > { %v2341_v60 = vpop.eup %2340 }
 0x7bb   : > { %v779_v61 = vmul.f32 %v2341_v60, %v777_v59  ;;  %vm784_vm8 = vweird.f32 %v2341_v60 }
 0x7bc   : > { %vm785_vm11 = vmor %vm783_vm10, %vm784_vm8 }
 0x7bd   : > { %v780_v62 = vsub.f32 1.0, %v779_v61 }
 0x7bf   : > { %v781_v63 = vmul.f32 %v2341_v60, %v780_v62 }
 0x7c1   : > { %v782_v0 = vadd.f32 %v2341_v60, %v781_v63 }
 0x7c3   : > { %v786_v2 = vsel %vm785_vm11, %v2341_v60, %v782_v0 }
 0x7c4   : > { %v791_v5 = vsel %vm788_vm12, %v790_v3, %v786_v2  ;;  %vm975_vm12 = vcmask 259205  }
 0x7c5   : > { %v797_v8 = vmul.f32 %v795_v7, %v791_v5 }
 0x822   : > { %v800_v4 = vpop.permute.xlu0 %799 }
 0x823   : > { %v802_v6 = vmul.f32 %v800_v4, %v791_v5 }
 0x825   : > { %804 = vrot.lane.b32.xlu1 %v802_v6, %s2390_s17 }
 0x897   : > { %v805_v9 = vpop.permute.xlu1 %804 }
 0x898   : > { %v807_v11 = vadd.f32 %v805_v9, %v797_v8 }
 0x89a   : > { %2342 = vtanh.f32 %v807_v11  ;;  %v872_v42 = vrot.slane %v807_v11, 7 }
 0x8a0   : > { %v2343_v13 = vpop.eup %2342 }
 0x8a1   : > { %810 = vrot.lane.b32.xlu2 %v2343_v13, %s2390_s17 }
 0x8fb   : > { %v811_v14 = vpop.permute.xlu2 %810 }
 0x8fc   : > { %v813_v15 = vmul.f32 %v811_v14, %v791_v5 }
 0x8fe   : > { %820 = vrot.lane.b32.xlu1 %v813_v15, %s2392_s18  ;;  %815 = vrot.lane.b32.xlu0 %v813_v15, %s2393_s13 }
 0x970   : > { %v821_v16 = vpop.permute.xlu1 %820  ;;  %v816_v17 = vpop.permute.xlu0 %815 }
 0x971   : > { %824 = vst.msk [vmem:[#allocation2 + $0x4] sm:$0x8] %vm823_vm13, %v821_v16  ;;  %v825_v19 = vsel %vm591_vm9, %v816_v17, %v821_v16  ;;  %vm970_vm13 = vcmask 128005  }
 0x972   : > { %819 = vst.msk [vmem:[#allocation2 + $0x3] sm:$0x8] %vm818_vm14, %v816_v17  ;;  %v826_v20 = vpack.c.bf16 %v825_v19, %v825_v19 }
 0x974   : > { %v828_v21 = vshrl.u32 %v826_v20, 16 }
 0x976   : > { %v830_v22 = vrot.slane %v828_v21, 1 }
 0x978   : > { %1960 = vmatmul.msk.bf16.vlgmr.msrb.gmra.mxu1 %vm485_vm0, %v830_v22 }
 0x9f5   : > { %v843_v23 = vpop.f32.mrf.mxu1 }
 0x9f6   : > { %v848_v24 = vrot.slane %v843_v23, 4 }
 0x9f8   : > { %v850_v25 = vadd.f32 %v848_v24, %v2510_v12 }
 0x9fa   : > { %2344 = vtanh.f32 %v850_v25  ;;  %v1961_v28 = vmul.f32 -1.442695, %v850_v25 }
 0x9fc   : > { %2346 = vpow2.f32 %v1961_v28 }
 0x9fd   : > { %v845_v26 = vpop.f32.mrf.mxu1 }
 0xa00   : > { %v2345_v27 = vpop.eup %2344 }
 0xa01   : > { %876 = vrot.lane.b32.xlu2 %v2345_v27, %s2389_s30 }
 0xa02   : > { %v2347_v29 = vpop.eup %2346 }
 0xa03   : > { %v854_v30 = vadd.f32 1.0, %v2347_v29 }
 0xa05   : > { %2348 = vrcp.f32 %v854_v30  ;;  %v866_v36 = vand.u32 2147483648, %v854_v30  ;;  %vm860_vm2 = vweird.f32 %v854_v30  ;;  %v864_v37 = vand.u32 2147483647, %v854_v30 }
 0xa07   : > { %v867_v38 = vor.u32 1.1754944e-38, %v866_v36  ;;  %vm865_vm4 = vcmp.eq.f32.partialorder %v864_v37, 8.507059e+37 }
 0xa0b   : > { %v2349_v31 = vpop.eup %2348 }
 0xa0c   : > { %v856_v32 = vmul.f32 %v2349_v31, %v854_v30  ;;  %vm861_vm15 = vweird.f32 %v2349_v31 }
 0xa0d   : > { %vm862_vm3 = vmor %vm860_vm2, %vm861_vm15 }
 0xa0e   : > { %v857_v33 = vsub.f32 1.0, %v856_v32 }
 0xa10   : > { %v858_v34 = vmul.f32 %v2349_v31, %v857_v33 }
 0xa12   : > { %v859_v35 = vadd.f32 %v2349_v31, %v858_v34 }
 0xa14   : > { %v863_v12 = vsel %vm862_vm3, %v2349_v31, %v859_v35 }
 0xa15   : > { %v868_v40 = vsel %vm865_vm4, %v867_v38, %v863_v12  ;;  %vm1052_vm4 = vcmask 260230  }
 0xa16   : > { %v874_v43 = vmul.f32 %v872_v42, %v868_v40 }
 0xa5b   : > { %v877_v39 = vpop.permute.xlu2 %876 }
 0xa5c   : > { %v879_v41 = vmul.f32 %v877_v39, %v868_v40 }
 0xa5e   : > { %881 = vrot.lane.b32.xlu0 %v879_v41, %s2390_s17 }
 0xad0   : > { %v882_v44 = vpop.permute.xlu0 %881 }
 0xad1   : > { %v884_v45 = vadd.f32 %v882_v44, %v874_v43 }
 0xad3   : > { %2350 = vtanh.f32 %v884_v45  ;;  %v947_v11 = vrot.slane %v884_v45, 7 }
 0xad9   : > { %v2351_v47 = vpop.eup %2350 }
 0xada   : > { %887 = vrot.lane.b32.xlu1 %v2351_v47, %s2390_s17 }
 0xb4c   : > { %v888_v48 = vpop.permute.xlu1 %887 }
 0xb4d   : > { %v890_v49 = vmul.f32 %v888_v48, %v868_v40 }
 0xb4f   : > { %897 = vrot.lane.b32.xlu0 %v890_v49, %s2392_s18  ;;  %892 = vrot.lane.b32.xlu2 %v890_v49, %s2393_s13 }
 0xba9   : > { %v893_v50 = vpop.permute.xlu2 %892 }
 0xbaa   : > { %896 = vst.msk [vmem:[#allocation2 + $0x3] sm:$0x10] %vm895_vm5, %v893_v50  ;;  %vm1047_vm5 = vcmask 129030  }
 0xbc1   : > { %v898_v51 = vpop.permute.xlu0 %897 }
 0xbc2   : > { %901 = vst.msk [vmem:[#allocation2 + $0x2] sm:$0x10] %vm900_vm6, %v898_v51  ;;  %v902_v52 = vsel %vm591_vm9, %v893_v50, %v898_v51 }
 0xbc3   : > { %v903_v54 = vpack.c.bf16 %v902_v52, %v902_v52 }
 0xbc5   : > { %v905_v55 = vrot.slane %v903_v54, 2 }
 0xbc7   : > { %1962 = vmatmul.msk.bf16.vlgmr.msrb.gmra.mxu2 %vm485_vm0, %v905_v55 }
 0xc4a   : > { %v918_v56 = vpop.f32.mrf.mxu2 }
 0xc4b   : > { %v923_v57 = vrot.slane %v918_v56, 3 }
 0xc4d   : > { %v925_v58 = vadd.f32 %v923_v57, %v2524_v46 }
 0xc4f   : > { %2352 = vtanh.f32 %v925_v58  ;;  %v1963_v61 = vmul.f32 -1.442695, %v925_v58 }
 0xc51   : > { %2354 = vpow2.f32 %v1963_v61 }
 0xc52   : > { %v920_v59 = vpop.f32.mrf.mxu2 }
 0xc55   : > { %v2353_v60 = vpop.eup %2352 }
 0xc56   : > { %951 = vrot.lane.b32.xlu1 %v2353_v60, %s2389_s30 }
 0xc57   : > { %v2355_v62 = vpop.eup %2354 }
 0xc58   : > { %v929_v63 = vadd.f32 1.0, %v2355_v62 }
 0xc5a   : > { %2356 = vrcp.f32 %v929_v63  ;;  %v941_v4 = vand.u32 2147483648, %v929_v63  ;;  %vm935_vm8 = vweird.f32 %v929_v63  ;;  %v939_v5 = vand.u32 2147483647, %v929_v63 }
 0xc5c   : > { %v942_v6 = vor.u32 1.1754944e-38, %v941_v4  ;;  %vm940_vm11 = vcmp.eq.f32.partialorder %v939_v5, 8.507059e+37 }
 0xc60   : > { %v2357_v0 = vpop.eup %2356 }
 0xc61   : > { %v931_v10 = vmul.f32 %v2357_v0, %v929_v63  ;;  %vm936_vm7 = vweird.f32 %v2357_v0 }
 0xc62   : > { %vm937_vm10 = vmor %vm935_vm8, %vm936_vm7 }
 0xc63   : > { %v932_v1 = vsub.f32 1.0, %v931_v10 }
 0xc65   : > { %v933_v2 = vmul.f32 %v2357_v0, %v932_v1 }
 0xc67   : > { %v934_v3 = vadd.f32 %v2357_v0, %v933_v2 }
 0xc69   : > { %v938_v46 = vsel %vm937_vm10, %v2357_v0, %v934_v3  ;;  %vm1122_vm10 = vcmask 130055  }
 0xc6a   : > { %v943_v8 = vsel %vm940_vm11, %v942_v6, %v938_v46  ;;  %vm1127_vm11 = vcmask 261255  }
 0xc6b   : > { %v949_v13 = vmul.f32 %v947_v11, %v943_v8 }
 0xcc8   : > { %v952_v7 = vpop.permute.xlu1 %951 }
 0xcc9   : > { %v954_v9 = vmul.f32 %v952_v7, %v943_v8 }
 0xccb   : > { %956 = vrot.lane.b32.xlu2 %v954_v9, %s2390_s17 }
 0xd25   : > { %v957_v14 = vpop.permute.xlu2 %956 }
 0xd26   : > { %v959_v15 = vadd.f32 %v957_v14, %v949_v13 }
 0xd28   : > { %2358 = vtanh.f32 %v959_v15  ;;  %v1024_v44 = vrot.slane %v959_v15, 7 }
 0xd2e   : > { %v2359_v16 = vpop.eup %2358 }
 0xd2f   : > { %962 = vrot.lane.b32.xlu0 %v2359_v16, %s2390_s17 }
 0xda1   : > { %v963_v17 = vpop.permute.xlu0 %962 }
 0xda2   : > { %v965_v19 = vmul.f32 %v963_v17, %v943_v8 }
 0xda4   : > { %972 = vrot.lane.b32.xlu2 %v965_v19, %s2392_s18  ;;  %967 = vrot.lane.b32.xlu1 %v965_v19, %s2393_s13 }
 0xdfe   : > { %v973_v20 = vpop.permute.xlu2 %972 }
 0xdff   : > { %976 = vst.msk [vmem:[#allocation2] sm:$0x20] %vm975_vm12, %v973_v20  ;;  %vm1147_vm12 = vcmask 1044480  }
 0xe16   : > { %v968_v21 = vpop.permute.xlu1 %967 }
 0xe17   : > { %971 = vst.msk [vmem:[#allocation2 + $0x3] sm:$0x20] %vm970_vm13, %v968_v21  ;;  %v977_v22 = vsel %vm591_vm9, %v968_v21, %v973_v20  ;;  %vm1140_vm13 = vcmask 1045504  }
 0xe18   : > { %v978_v23 = vpack.c.bf16 %v977_v22, %v977_v22 }
 0xe1a   : > { %v980_v24 = vshrl.u32 %v978_v23, 16 }
 0xe1c   : > { %v982_v25 = vrot.slane %v980_v24, 2 }
 0xe1e   : > { %1964 = vmatmul.msk.bf16.vlgmr.msrb.gmra.mxu3 %vm485_vm0, %v982_v25 }
 0xea1   : > { %v995_v26 = vpop.f32.mrf.mxu3 }
 0xea2   : > { %v1000_v27 = vrot.slane %v995_v26, 2 }
 0xea4   : > { %v1002_v28 = vadd.f32 %v1000_v27, %v2537_v18 }
 0xea6   : > { %2360 = vtanh.f32 %v1002_v28  ;;  %v1965_v31 = vmul.f32 -1.442695, %v1002_v28 }
 0xea8   : > { %2362 = vpow2.f32 %v1965_v31 }
 0xea9   : > { %v997_v29 = vpop.f32.mrf.mxu3 }
 0xeac   : > { %v2361_v30 = vpop.eup %2360 }
 0xead   : > { %1028 = vrot.lane.b32.xlu0 %v2361_v30, %s2389_s30 }
 0xeae   : > { %v2363_v32 = vpop.eup %2362 }
 0xeaf   : > { %v1006_v33 = vadd.f32 1.0, %v2363_v32 }
 0xeb1   : > { %2364 = vrcp.f32 %v1006_v33  ;;  %v1018_v38 = vand.u32 2147483648, %v1006_v33  ;;  %vm1012_vm15 = vweird.f32 %v1006_v33  ;;  %v1016_v39 = vand.u32 2147483647, %v1006_v33 }
 0xeb3   : > { %v1019_v40 = vor.u32 1.1754944e-38, %v1018_v38  ;;  %vm1017_vm3 = vcmp.eq.f32.partialorder %v1016_v39, 8.507059e+37 }
 0xeb7   : > { %v2365_v34 = vpop.eup %2364 }
 0xeb8   : > { %v1008_v35 = vmul.f32 %v2365_v34, %v1006_v33  ;;  %vm1013_vm14 = vweird.f32 %v2365_v34 }
 0xeb9   : > { %vm1014_vm2 = vmor %vm1012_vm15, %vm1013_vm14  ;;  %vm1166_vm14 = vcmask 1041408   ;;  %vm1133_vm15 = vcmask 1046528  }
 0xeba   : > { %v1009_v36 = vsub.f32 1.0, %v1008_v35 }
 0xebc   : > { %v1010_v37 = vmul.f32 %v2365_v34, %v1009_v36 }
 0xebe   : > { %v1011_v12 = vadd.f32 %v2365_v34, %v1010_v37 }
 0xec0   : > { %v1015_v18 = vsel %vm1014_vm2, %v2365_v34, %v1011_v12  ;;  %vm1159_vm2 = vcmask 1042432  }
 0xec1   : > { %v1020_v42 = vsel %vm1017_vm3, %v1019_v40, %v1015_v18  ;;  %v2237_v40 = vld [vmem:[%s2821_s4 + $0x38] sm:$0xff]  ;;  %vm1154_vm3 = vcmask 1043456  }
 0xec2   : > { %v1026_v45 = vmul.f32 %v1024_v44, %v1020_v42  ;;  %1300 = vmatpush.bf16.msra.mxu1 %v2237_v40  ;;  %v2235_v44 = vld [vmem:[%s2821_s4 + $0x28] sm:$0xff] }
 0xf1f   : > { %v1029_v41 = vpop.permute.xlu0 %1028 }
 0xf20   : > { %v1031_v43 = vmul.f32 %v1029_v41, %v1020_v42  ;;  %v2243_v41 = vld [vmem:[%s2821_s4 + $0x68] sm:$0xff] }
 0xf21   : > { %1315 = vmatpush.bf16.msra.mxu2 %v2243_v41  ;;  %v1510_v41 = vld [vmem:[%s2825_s8 + $0x38] sm:$0xf] }
 0xf22   : > { %1033 = vrot.lane.b32.xlu1 %v1031_v43, %s2390_s17  ;;  %v2242_v43 = vld [vmem:[%s2821_s4 + $0x60] sm:$0xff] }
 0xf25   : > { %1316 = vmatpush.bf16.msra.mxu2 %v2242_v43  ;;  %v1631_v43 = vunpack.c.l.b16 %v1510_v41 }
 0xf94   : > { %v1034_v47 = vpop.permute.xlu1 %1033 }
 0xf95   : > { %v1036_v48 = vadd.f32 %v1034_v47, %v1026_v45  ;;  %v2241_v45 = vld [vmem:[%s2821_s4 + $0x58] sm:$0xff]  ;;  %v2234_v47 = vld [vmem:[%s2821_s4 + $0x20] sm:$0xff] }
 0xf96   : > { %1317 = vmatpush.bf16.msra.mxu2 %v2241_v45  ;;  %v2090_v45 = vld [vmem:[%s2825_s8 + $0x74] sm:$0xf] }
 0xf97   : > { %2366 = vtanh.f32 %v1036_v48  ;;  %v1099_v13 = vrot.slane %v1036_v48, 7  ;;  %v2240_v48 = vld [vmem:[%s2821_s4 + $0x50] sm:$0xff] }
 0xf9a   : > { %1318 = vmatpush.bf16.msra.mxu2 %v2240_v48  ;;  %v1639_v48 = vpack.c.b16 %v1631_v43, %v1631_v43 }
 0xf9d   : > { %v2367_v49 = vpop.eup %2366 }
 0xf9e   : > { %1039 = vrot.lane.b32.xlu2 %v2367_v49, %s2390_s17  ;;  %v2233_v49 = vld [vmem:[%s2821_s4 + $0x18] sm:$0xff] }
 0xff8   : > { %v1040_v50 = vpop.permute.xlu2 %1039 }
 0xff9   : > { %v1042_v51 = vmul.f32 %v1040_v50, %v1020_v42  ;;  %v2236_v42 = vld [vmem:[%s2821_s4 + $0x30] sm:$0xff] }
 0xffa   : > { %1301 = vmatpush.bf16.msra.mxu1 %v2236_v42  ;;  %v2232_v50 = vld [vmem:[%s2821_s4 + $0x10] sm:$0xff] }
 0xffb   : > { %1049 = vrot.lane.b32.xlu1 %v1042_v51, %s2392_s18  ;;  %1044 = vrot.lane.b32.xlu0 %v1042_v51, %s2393_s13  ;;  %v2239_v51 = vld [vmem:[%s2821_s4 + $0x48] sm:$0xff]  ;;  %v2163_v42 = vld [vmem:[%s2825_s8 + $0xb0] sm:$0xf] }
 0xffc   : > { %1319 = vmatpush.bf16.msra.mxu2 %v2239_v51  ;;  %v1651_v51 = vsel %vm1154_vm3, %v1639_v48, 0 }
 0xffe   : > { %1302 = vmatpush.bf16.msra.mxu1 %v2235_v44  ;;  %v1712_v44 = vunpack.c.l.b16 %v2163_v42 }
0x1002   : > { %1303 = vmatpush.bf16.msra.mxu1 %v2234_v47  ;;  %v1566_v47 = vunpack.c.l.b16 %v2090_v45 }
0x1006   : > { %1304 = vmatpush.bf16.msra.mxu1 %v2233_v49  ;;  %v1720_v49 = vpack.c.b16 %v1712_v44, %v1712_v44 }
0x100a   : > { %1305 = vmatpush.bf16.msra.mxu1 %v2232_v50  ;;  %v1574_v50 = vpack.c.b16 %v1566_v47, %v1566_v47  ;;  %v2311_v47 = vld [vmem:[%s2826_s9] ss:$0 sm:$0xff] }
0x106d   : > { %v1050_v52 = vpop.permute.xlu1 %1049  ;;  %v1045_v54 = vpop.permute.xlu0 %1044 }
0x106e   : > { %1053 = vst.msk [vmem:[#allocation2 - $0x2] sm:$0x40] %vm1052_vm4, %v1050_v52  ;;  %v1054_v55 = vsel %vm591_vm9, %v1045_v54, %v1050_v52  ;;  %v2231_v52 = vld [vmem:[%s2821_s4 + $0x8] sm:$0xff]  ;;  %vm1175_vm4 = vcmask 785408  }
0x106f   : > { %1048 = vst.msk [vmem:[#allocation2 + $0x3] sm:$0x40] %vm1047_vm5, %v1045_v54  ;;  %v1055_v56 = vpack.c.bf16 %v1054_v55, %v1054_v55  ;;  %1306 = vmatpush.bf16.msra.mxu1 %v2231_v52  ;;  %v2238_v54 = vld [vmem:[%s2821_s4 + $0x40] sm:$0xff]  ;;  %vm1336_vm5 = vcmask 1040384   ;;  %v1732_v52 = vsel %vm1154_vm3, %v1720_v49, 0 }
0x1070   : > { %v2230_v55 = vld [vmem:[%s2821_s4] sm:$0xff]  ;;  %1320 = vmatpush.bf16.msra.mxu2 %v2238_v54  ;;  %v2259_v54 = vld [vmem:[%s2825_s8 + $0x30] sm:$0xff] }
0x1071   : > { %v1057_v57 = vrot.slane %v1055_v56, 3 }
0x1073   : > { %1966 = vmatmul.msk.bf16.vlgmr.msra.gmra.mxu0 %vm485_vm0, %v1057_v57  ;;  %1307 = vmatpush.bf16.msra.mxu1 %v2230_v55  ;;  %v1587_v55 = vsel %vm1154_vm3, %v1574_v50, 0 }
0x1074   : > { %1589 = vmatpush.bf16.msrb.mxu2 %v1587_v55  ;;  %v2280_v55 = vld [vmem:[%s2829_s12 + $0x18] sm:$0xff] }
0x1077   : > { %1734 = vmatpush.bf16.msrb.mxu1 %v1732_v52 }
0x10f0   : > { %v1070_v58 = vpop.f32.mrf.mxu0 }
0x10f1   : > { %v1075_v59 = vrot.slane %v1070_v58, 1 }
0x10f3   : > { %v1077_v60 = vadd.f32 %v1075_v59, %v2550_v53 }
0x10f5   : > { %2368 = vtanh.f32 %v1077_v60  ;;  %v1967_v63 = vmul.f32 -1.442695, %v1077_v60 }
0x10f7   : > { %2370 = vpow2.f32 %v1967_v63 }
0x10f8   : > { %v1072_v61 = vpop.f32.mrf.mxu0 }
0x10fb   : > { %v2369_v62 = vpop.eup %2368 }
0x10fc   : > { %1103 = vrot.lane.b32.xlu2 %v2369_v62, %s2389_s30 }
0x10fd   : > { %v2371_v0 = vpop.eup %2370 }
0x10fe   : > { %v1081_v10 = vadd.f32 1.0, %v2371_v0 }
0x1100   : > { %2372 = vrcp.f32 %v1081_v10  ;;  %v1093_v46 = vand.u32 2147483648, %v1081_v10  ;;  %vm1087_vm6 = vweird.f32 %v1081_v10  ;;  %v1091_v6 = vand.u32 2147483647, %v1081_v10 }
0x1102   : > { %v1094_v7 = vor.u32 1.1754944e-38, %v1093_v46  ;;  %vm1092_vm8 = vcmp.eq.f32.partialorder %v1091_v6, 8.507059e+37 }
0x1106   : > { %v2373_v1 = vpop.eup %2372 }
0x1107   : > { %v1083_v2 = vmul.f32 %v2373_v1, %v1081_v10  ;;  %vm1088_vm9 = vweird.f32 %v2373_v1 }
0x1108   : > { %vm1089_vm7 = vmor %vm1087_vm6, %vm1088_vm9  ;;  %vm1582_vm9 = vcmask 982016   ;;  %vm1792_vm6 = vcmask 457728  }
0x1109   : > { %v1084_v3 = vsub.f32 1.0, %v1083_v2 }
0x110b   : > { %v1085_v4 = vmul.f32 %v2373_v1, %v1084_v3 }
0x110d   : > { %v1086_v5 = vadd.f32 %v2373_v1, %v1085_v4 }
0x110f   : > { %v1090_v53 = vsel %vm1089_vm7, %v2373_v1, %v1086_v5 }
0x1110   : > { %v1095_v9 = vsel %vm1092_vm8, %v1094_v7, %v1090_v53  ;;  %v2246_v53 = vld [vmem:[%s2823_s6 + $0x10] sm:$0xff]  ;;  %v2249_v7 = vld [vmem:[%s2823_s6 + $0x28] sm:$0xff] }
0x1111   : > { %v1101_v14 = vmul.f32 %v1099_v13, %v1095_v9  ;;  %1423 = vmatpush.bf16.msrb.mxu0 %v2246_v53  ;;  %1389 = vmatpush.bf16.msra.mxu3 %v2249_v7  ;;  %v2247_v13 = vld [vmem:[%s2823_s6 + $0x18] sm:$0xff]  ;;  %v2255_v53 = vld [vmem:[%s2825_s8 + $0x10] sm:$0xff] }
0x1156   : > { %v1104_v8 = vpop.permute.xlu2 %1103 }
0x1157   : > { %v1106_v11 = vmul.f32 %v1104_v8, %v1095_v9  ;;  %v2245_v8 = vld [vmem:[%s2823_s6 + $0x8] sm:$0xff] }
0x1158   : > { %1424 = vmatpush.bf16.msrb.mxu0 %v2245_v8 }
0x1159   : > { %1108 = vrot.lane.b32.xlu0 %v1106_v11, %s2390_s17  ;;  %v2244_v11 = vld [vmem:[%s2823_s6] sm:$0xff] }
0x115c   : > { %1425 = vmatpush.bf16.msrb.mxu0 %v2244_v11 }
0x1160   : > { %1653 = vmatpush.bf16.msra.mxu0 %v1651_v51 }
0x1164   : > { %1654 = vmatpush.bf16.msra.mxu0 %v2259_v54  ;;  %v2274_v54 = vld [vmem:[%s2827_s10] sm:$0xff] }
0x11cb   : > { %v1109_v15 = vpop.permute.xlu0 %1108 }
0x11cc   : > { %v1111_v16 = vadd.f32 %v1109_v15, %v1101_v14  ;;  %v2309_v14 = vld [vmem:[%s2822_s5] ss:$0 sm:$0xff] }
0x11ce   : > { %2374 = vtanh.f32 %v1111_v16 }
0x11d4   : > { %v2375_v17 = vpop.eup %2374 }
0x11d5   : > { %1114 = vrot.lane.b32.xlu1 %v2375_v17, %s2390_s17  ;;  %v2252_v17 = vld [vmem:[%s2823_s6 + $0x40] sm:$0xff] }
0x1247   : > { %v1115_v19 = vpop.permute.xlu1 %1114 }
0x1248   : > { %v1117_v20 = vmul.f32 %v1115_v19, %v1095_v9  ;;  %v2248_v9 = vld [vmem:[%s2823_s6 + $0x20] sm:$0xff] }
0x1249   : > { %1390 = vmatpush.bf16.msra.mxu3 %v2248_v9 }
0x124a   : > { %1124 = vrot.lane.b32.xlu0 %v1117_v20, %s2392_s18  ;;  %1119 = vrot.lane.b32.xlu2 %v1117_v20, %s2393_s13 }
0x124d   : > { %1391 = vmatpush.bf16.msra.mxu3 %v2247_v13  ;;  %v2254_v13 = vld [vmem:[%s2825_s8 + $0x8] sm:$0xff] }
0x1251   : > { %1465 = vmatpush.bf16.msrb.mxu3 %v2252_v17  ;;  %v2262_v17 = vld [vmem:[%s2825_s8 + $0x4c] sm:$0xff] }
0x12a4   : > { %v1120_v21 = vpop.permute.xlu2 %1119 }
0x12a5   : > { %1123 = vst.msk [vmem:[#allocation2 + $0x3] sm:$0x80] %vm1122_vm10, %v1120_v21  ;;  %v2251_v21 = vld [vmem:[%s2823_s6 + $0x38] sm:$0xff]  ;;  %vm1881_vm10 = vcmask 0  }
0x12a6   : > { %1466 = vmatpush.bf16.msrb.mxu3 %v2251_v21  ;;  %v2267_v21 = vld [vmem:[%s2825_s8 + $0x78] sm:$0xff] }
0x12ac   : > { %v2590_v23 = vld [vmem:[#allocation2 + $0x8] sm:$0x3f] }
0x12ad   : > { %v1149_v25 = vrot.slane %v2590_v23, 3  ;;  %v1142_v26 = vrot.slane %v2590_v23, 2  ;;  %v1168_v27 = vrot.slane %v2590_v23, 6  ;;  %v1135_v28 = vrot.slane %v2590_v23, 1 }
0x12ae   : > { %v1161_v34 = vrot.slane %v2590_v23, 5  ;;  %v1156_v58 = vrot.slane %v2590_v23, 4 }
0x12bc   : > { %v1125_v22 = vpop.permute.xlu0 %1124 }
0x12bd   : > { %1128 = vst.msk [vmem:[#allocation2 - $0x4] sm:$0x80] %vm1127_vm11, %v1125_v22 }
0x12c4   : > { %v2592_v24 = vld [vmem:[#allocation2] sm:$0xff] }
0x12c5   : > { %v1148_v29 = vrot.slane %v2592_v24, 3  ;;  %v1141_v30 = vrot.slane %v2592_v24, 2  ;;  %v1167_v31 = vrot.slane %v2592_v24, 6  ;;  %v1134_v32 = vrot.slane %v2592_v24, 1 }
0x12c6   : > { %v1160_v33 = vrot.slane %v2592_v24, 5  ;;  %v1155_v56 = vrot.slane %v2592_v24, 4 }
0x12c7   : > { %v1150_v35 = vsel %vm1147_vm12, %v1148_v29, %v1149_v25  ;;  %v1143_v36 = vsel %vm1140_vm13, %v1141_v30, %v1142_v26  ;;  %v1169_v37 = vsel %vm1166_vm14, %v1167_v31, %v1168_v27  ;;  %v1136_v12 = vsel %vm1133_vm15, %v1134_v32, %v1135_v28 }
0x12c8   : > { %1151 = vrot.lane.b32.xlu0 %v1150_v35, %s2393_s13  ;;  %v2303_v38 = vpack.i.bf16 %v1143_v36, %v1169_v37  ;;  %v1162_v39 = vsel %vm1159_vm2, %v1160_v33, %v1161_v34  ;;  %v1157_v0 = vsel %vm1154_vm3, %v1155_v56, %v1156_v58  ;;  %v2273_v56 = vld [vmem:[%s2825_s8 + $0xa8] sm:$0xff] }
0x12c9   : > { %v2298_v18 = vpack.i.bf16 %v1136_v12, %v1162_v39  ;;  %v2266_v58 = vld [vmem:[%s2825_s8 + $0x6c] sm:$0xff]  ;;  %1735 = vmatpush.bf16.msrb.mxu1 %v2273_v56 }
0x12ca   : > { %2304 = vrot.lane.b32.xlu2 %v2303_v38, %s2394_s19  ;;  %1590 = vmatpush.bf16.msrb.mxu2 %v2266_v58  ;;  %v2279_v56 = vld [vmem:[%s2829_s12 + $0x10] sm:$0xff] }
0x12cb   : > { %2299 = vrot.lane.b32.xlu1 %v2298_v18, %s2395_s20 }
0x1324   : > { %v2305_v57 = vpop.permute.xlu2 %2304 }
0x1325   : > { %v2307_v62 = vunpack.i.h.bf16 %v2305_v57  ;;  %v2306_v63 = vunpack.i.l.bf16 %v2305_v57 }
0x133a   : > { %v1152_v2 = vpop.permute.xlu0 %1151 }
0x133d   : > { %v2300_v59 = vpop.permute.xlu1 %2299 }
0x133e   : > { %v2302_v60 = vunpack.i.h.bf16 %v2300_v59  ;;  %v2301_v61 = vunpack.i.l.bf16 %v2300_v59  ;;  %v2258_v59 = vld [vmem:[%s2825_s8 + $0x28] sm:$0xff] }
0x133f   : > { %1655 = vmatpush.bf16.msra.mxu0 %v2258_v59 }
0x1340   : > { %v1173_v10 = vsel %vm485_vm0, %v2592_v24, %v2302_v60  ;;  %v1177_v1 = vsel %vm485_vm0, %v1157_v0, %v2301_v61  ;;  %vm1327_vm0 = vcmask 392192   ;;  %v2250_v24 = vld [vmem:[%s2823_s6 + $0x30] sm:$0xff]  ;;  %v2272_v60 = vld [vmem:[%s2825_s8 + $0xa0] sm:$0xff] }
0x1341   : > { %v1174_v3 = vsel %vm540_vm1, %v1173_v10, %v2307_v62  ;;  %v1178_v4 = vsel %vm540_vm1, %v1177_v1, %v2306_v63  ;;  %1467 = vmatpush.bf16.msrb.mxu3 %v2250_v24  ;;  %v2265_v61 = vld [vmem:[%s2825_s8 + $0x64] sm:$0xff]  ;;  %v2310_v63 = vld [vmem:[%s2824_s7] ss:$0 sm:$0xff]  ;;  %1736 = vmatpush.bf16.msrb.mxu1 %v2272_v60  ;;  %v2271_v10 = vld [vmem:[%s2825_s8 + $0x98] sm:$0xff] }
0x1342   : > { %v1180_v5 = vpack.c.bf16 %v1178_v4, %v1178_v4  ;;  %v1176_v46 = vsel %vm1175_vm4, %v1174_v3, %v1152_v2  ;;  %v2257_v0 = vld [vmem:[%s2825_s8 + $0x20] sm:$0xff]  ;;  %1591 = vmatpush.bf16.msrb.mxu2 %v2265_v61 }
0x1343   : > { %v1179_v6 = vpack.c.bf16 %v1176_v46, %v1176_v46  ;;  %v2264_v2 = vld [vmem:[%s2825_s8 + $0x5c] sm:$0xff]  ;;  %1656 = vmatpush.bf16.msra.mxu0 %v2257_v0  ;;  %v2270_v46 = vld [vmem:[%s2825_s8 + $0x90] sm:$0xff] }
0x1344   : > { %2024 = vmatmul.msk.bf16.vlgmr.msra.gmra.mxu2 %vm1175_vm4, %v1180_v5  ;;  %v2256_v5 = vld [vmem:[%s2825_s8 + $0x18] sm:$0xff]  ;;  %v2277_v61 = vld [vmem:[%s2829_s12] sm:$0xff] }
0x1345   : > { %1308 = vmatmul.bf16.vlgmr.msra.gmra.mxu1 %v1179_v6 }
0x1346   : > { %1737 = vmatpush.bf16.msrb.mxu1 %v2271_v10  ;;  %1592 = vmatpush.bf16.msrb.mxu2 %v2264_v2  ;;  %v1821_v2 = vld [vmem:[#allocation5] sm:$0x1] }
0x1347   : > { %1657 = vmatpush.bf16.msra.mxu0 %v2256_v5 }
0x134a   : > { %1738 = vmatpush.bf16.msrb.mxu1 %v2270_v46 }
0x134b   : > { %1658 = vmatpush.bf16.msra.mxu0 %v2255_v53 }
0x134f   : > { %1659 = vmatpush.bf16.msra.mxu0 %v2254_v13 }
0x13c2   : > { %v1309_v15 = vpop.f32.mrf.mxu1 }
0x13c3   : > { %v1310_v16 = vadd.f32 %v2309_v14, %v1309_v15  ;;  %v2263_v14 = vld [vmem:[%s2825_s8 + $0x54] sm:$0xff]  ;;  %v2269_v15 = vld [vmem:[%s2825_s8 + $0x88] sm:$0xff] }
0x13c4   : > { %1593 = vmatpush.bf16.msrb.mxu2 %v2263_v14  ;;  %1739 = vmatpush.bf16.msrb.mxu1 %v2269_v15 }
0x13c7   : > { %v1322_v19 = vpop.f32.mrf.mxu2 }
0x13c8   : > { %v1323_v20 = vadd.f32 %v1322_v19, %v1310_v16  ;;  %v2253_v16 = vld [vmem:[%s2825_s8] sm:$0xff]  ;;  %1594 = vmatpush.bf16.msrb.mxu2 %v2262_v17 }
0x13c9   : > { %1660 = vmatpush.bf16.msra.mxu0 %v2253_v16  ;;  %v2268_v19 = vld [vmem:[%s2825_s8 + $0x80] sm:$0xff] }
0x13ca   : > { %v1326_v22 = vmax.f32 %v1323_v20, 0.0  ;;  %v1311_v23 = vpop.f32.mrf.mxu1  ;;  %1740 = vmatpush.bf16.msrb.mxu1 %v2268_v19  ;;  %v2261_v20 = vld [vmem:[%s2825_s8 + $0x44] sm:$0xff] }
0x13cc   : > { %1328 = vst.msk [vmem:[#allocation3] sm:$0xff] %vm1327_vm0, %v1326_v22  ;;  %1595 = vmatpush.bf16.msrb.mxu2 %v2261_v20  ;;  %v2260_v22 = vld [vmem:[%s2825_s8 + $0x3c] sm:$0xff] }
0x13ce   : > { %1741 = vmatpush.bf16.msrb.mxu1 %v2267_v21 }
0x13cf   : > { %v1324_v25 = vpop.f32.mrf.mxu2 }
0x13d0   : > { %1596 = vmatpush.bf16.msrb.mxu2 %v2260_v22 }
0x13d3   : > { %v1329_v26 = vld [vmem:[#allocation3] ss:$2 sm:$0xf]  ;;  %v1331_v27 = vld [vmem:[#allocation3 + $0x1] ss:$2 sm:$0xf] }
0x13d4   : > { %v1332_v28 = vmax.f32 %v1329_v26, %v1331_v27 }
0x13d6   : > { %v1334_v29 = vrot.slane %v1332_v28, 7 }
0x13d8   : > { %v1337_v30 = vsel %vm1336_vm5, 0.0, %v1334_v29 }
0x13d9   : > { %v1338_v31 = vsel %vm1147_vm12, %v1337_v30, 0.0 }
0x13da   : > { %v1339_v32 = vpack.c.bf16 %v1338_v31, %v1338_v31 }
0x13dc   : > { %v1354_v33 = vunpack.c.l.b16 %v1339_v32  ;;  %2056 = vmatmul.msk.bf16.vlgmr.msrb.gmra.mxu0 %vm1327_vm0, %v1339_v32 }
0x13de   : > { %v1355_v34 = vpack.c.b16 %v1354_v33, %v1354_v33 }
0x13e0   : > { %v1359_v35 = vshll.u32 %v1355_v34, 16  ;;  %v1357_v36 = vshrl.u32 %v1355_v34, 16  ;;  %v1438_v38 = vrot.slane %v1355_v34, 1 }
0x13e2   : > { %v1361_v37 = vrot.slane %v1359_v35, 1 }
0x13e4   : > { %v1362_v12 = vor.u32 %v1361_v37, %v1357_v36  ;;  %v1769_v36 = vld [vmem:[%s2827_s10 + $0x18] sm:$0xf] }
0x13e5   : > { %v1784_v37 = vunpack.c.l.b16 %v1769_v36 }
0x13e6   : > { %2043 = vmatmul.msk.bf16.vlgmr.msra.gmra.mxu3 %vm1327_vm0, %v1362_v12 }
0x13e7   : > { %v1788_v12 = vpack.c.b16 %v1784_v37, %v1784_v37 }
0x13f6   : > { %2075 = vmatmul.msk.bf16.vlgmr.msrb.gmra.mxu3 %vm1327_vm0, %v1438_v38 }
0x1459   : > { %v1427_v39 = vpop.f32.mrf.mxu0 }
0x1461   : > { %v1429_v18 = vpop.f32.mrf.mxu0 }
0x1462   : > { %v2276_v18 = vld [vmem:[%s2827_s10 + $0x10] sm:$0xff] }
0x1469   : > { %v1393_v40 = vpop.f32.mrf.mxu3 }
0x146a   : > { %v1428_v62 = vadd.f32 %v1427_v39, %v1393_v40  ;;  %v1797_v39 = vsel %vm1154_vm3, %v1788_v12, 0  ;;  %v2275_v40 = vld [vmem:[%s2827_s10 + $0x8] sm:$0xff] }
0x146b   : > { %1803 = vmatpush.bf16.msra.mxu3 %v1797_v39 }
0x146f   : > { %1804 = vmatpush.bf16.msra.mxu3 %v2276_v18 }
0x1471   : > { %v1395_v57 = vpop.f32.mrf.mxu3 }
0x1472   : > { %v2278_v57 = vld [vmem:[%s2829_s12 + $0x8] sm:$0xff] }
0x1473   : > { %1805 = vmatpush.bf16.msra.mxu3 %v2275_v40 }
0x1477   : > { %1806 = vmatpush.bf16.msra.mxu3 %v2274_v54 }
0x1479   : > { %v1469_v1 = vpop.f32.mrf.mxu3 }
0x147a   : > { %v1473_v3 = vadd.f32 %v1469_v1, %v1428_v62  ;;  %v1770_v62 = vld [vmem:[%s2828_s11] sm:$0x1] }
0x147b   : > { %1853 = vmatpush.bf16.msrb.mxu3 %v2280_v55 }
0x147c   : > { %v1478_v4 = vadd.f32 %v2310_v63, %v1473_v3 }
0x147e   : > { %v1479_v6 = vmax.f32 %v1478_v4, 0.0 }
0x147f   : > { %1854 = vmatpush.bf16.msrb.mxu3 %v2279_v56 }
0x1480   : > { %1480 = vst [vmem:[#allocation4] sm:$0xf] %v1479_v6 }
0x1481   : > { %v1471_v7 = vpop.f32.mrf.mxu3 }
0x1483   : > { %1855 = vmatpush.bf16.msrb.mxu3 %v2278_v57 }
0x1487   : > { %v1481_v8 = vld [vmem:[#allocation4] ss:$2 sm:$0x3]  ;;  %v1483_v9 = vld [vmem:[#allocation4 + $0x1] ss:$2 sm:$0x3]  ;;  %1856 = vmatpush.bf16.msrb.mxu3 %v2277_v61 }
0x1488   : > { %v1484_v11 = vmax.f32 %v1481_v8, %v1483_v9 }
0x148a   : > { %1486 = vrot.lane.b32.xlu1 %v1484_v11, %s2396_s26 }
0x14fc   : > { %v1487_v23 = vpop.permute.xlu1 %1486 }
0x14fd   : > { %v1489_v24 = vmax.f32 %v1484_v11, %v1487_v23 }
0x14ff   : > { %v1491_v25 = vrot.slane %v1489_v24, 7 }
0x1501   : > { %v1493_v26 = vsel %vm1336_vm5, 0.0, %v1491_v25 }
0x1502   : > { %v1494_v27 = vsel %vm1159_vm2, %v1493_v26, 0.0 }
0x1503   : > { %v1495_v28 = vpack.c.bf16 %v1494_v27, %v1494_v27 }
0x1505   : > { %v1528_v29 = vunpack.c.l.b16 %v1495_v28  ;;  %2148 = vmatmul.msk.bf16.vlgmr.msra.gmra.mxu0 %vm1582_vm9, %v1495_v28 }
0x1507   : > { %v1529_v30 = vpack.c.b16 %v1528_v29, %v1528_v29 }
0x1509   : > { %v1533_v31 = vshll.u32 %v1529_v30, 16  ;;  %v1682_v32 = vrot.slane %v1529_v30, 1  ;;  %v1531_v33 = vshrl.u32 %v1529_v30, 16 }
0x150b   : > { %v1535_v34 = vrot.slane %v1533_v31, 1  ;;  %2192 = vmatmul.msk.bf16.vlgmr.msrb.gmra.mxu1 %vm1582_vm9, %v1682_v32 }
0x150d   : > { %v1536_v35 = vor.u32 %v1535_v34, %v1531_v33 }
0x150f   : > { %2119 = vmatmul.msk.bf16.vlgmr.msrb.gmra.mxu2 %vm1582_vm9, %v1536_v35 }
0x1582   : > { %v1662_v38 = vpop.f32.mrf.mxu0 }
0x1588   : > { %v1743_v41 = vpop.f32.mrf.mxu1 }
0x158a   : > { %v1664_v42 = vpop.f32.mrf.mxu0 }
0x1590   : > { %v1745_v43 = vpop.f32.mrf.mxu1 }
0x1592   : > { %v1598_v44 = vpop.f32.mrf.mxu2 }
0x1593   : > { %v1663_v45 = vadd.f32 %v1662_v38, %v1598_v44 }
0x1595   : > { %v1747_v48 = vadd.f32 %v1743_v41, %v1663_v45 }
0x1597   : > { %v1752_v49 = vadd.f32 %v2311_v47, %v1747_v48 }
0x1599   : > { %v1754_v50 = vrot.slane %v1752_v49, 1 }
0x159a   : > { %v1600_v51 = vpop.f32.mrf.mxu2 }
0x159b   : > { %v1756_v52 = vmax.f32 %v1752_v49, %v1754_v50 }
0x159d   : > { %1758 = vrot.lane.b32.xlu2 %v1756_v52, %s2396_s26 }
0x15f7   : > { %v1759_v58 = vpop.permute.xlu2 %1758 }
0x15f8   : > { %v1761_v59 = vmax.f32 %v1756_v52, %v1759_v58 }
0x15fa   : > { %v1762_v60 = vpack.c.bf16 %v1761_v59, %v1761_v59 }
0x15fc   : > { %2205 = vmatmul.msk.bf16.vlgmr.msra.gmra.mxu3 %vm1792_vm6, %v1762_v60 }
0x167f   : > { %v1808_v63 = vpop.f32.mrf.mxu3 }
0x1680   : > { %v1809_v0 = vadd.f32 %v1808_v63, %v1770_v62 }
0x1682   : > { %v1812_v10 = vpack.c.bf16 %v1809_v0, %v1809_v0 }
0x1684   : > { %2222 = vmatmul.msk.bf16.vlgmr.msrb.gmra.mxu3 %vm540_vm1, %v1812_v10 }
0x1687   : > { %v1810_v1 = vpop.f32.mrf.mxu3 }
0x1707   : > { %v1858_v3 = vpop.f32.mrf.mxu3 }
0x1708   : > { %v1859_v4 = vadd.f32 %v1858_v3, %v1821_v2 }
0x170a   : > { %v2223_v5 = vmul.f32 -1.442695, %v1859_v4 }
0x170c   : > { %2376 = vpow2.f32 %v2223_v5 }
0x170f   : > { %v1860_v46 = vpop.f32.mrf.mxu3 }
0x1712   : > { %v2377_v6 = vpop.eup %2376 }
0x1713   : > { %v1865_v53 = vadd.f32 1.0, %v2377_v6 }
0x1715   : > { %2378 = vrcp.f32 %v1865_v53  ;;  %v1877_v11 = vand.u32 2147483648, %v1865_v53  ;;  %v1875_v14 = vand.u32 2147483647, %v1865_v53  ;;  %vm1871_vm1 = vweird.f32 %v1865_v53 }
0x1717   : > { %v1878_v16 = vor.u32 1.1754944e-38, %v1877_v11  ;;  %vm1876_vm11 = vcmp.eq.f32.partialorder %v1875_v14, 8.507059e+37 }
0x171b   : > { %v2379_v7 = vpop.eup %2378 }
0x171c   : > { %v1867_v8 = vmul.f32 %v2379_v7, %v1865_v53  ;;  %vm1872_vm7 = vweird.f32 %v2379_v7 }
0x171d   : > { %vm1873_vm8 = vmor %vm1871_vm1, %vm1872_vm7 }
0x171e   : > { %v1868_v9 = vsub.f32 1.0, %v1867_v8 }
0x1720   : > { %v1869_v13 = vmul.f32 %v2379_v7, %v1868_v9 }
0x1722   : > { %v1870_v15 = vadd.f32 %v2379_v7, %v1869_v13 }
0x1724   : > { %v1874_v17 = vsel %vm1873_vm8, %v2379_v7, %v1870_v15 }
0x1725   : > { %v1879_v19 = vsel %vm1876_vm11, %v1878_v16, %v1874_v17 }
0x1726   : > { %1882 = vst.msk [vmem:[%s462_s23] sm:$0x1] %vm1881_vm10, %v1879_v19 }
0x1727 PF: > { %s26_s15 = sadd.s32 1, %s2386_s15  }
0x1728   : > { %p23_p4 = scmp.ge.s32.totalorder %s26_s15, 4  }
0x172a   :  { %25 = sbr.rel (!%p23_p4) target bundleno = 3 (0x3), region = 112 }

</bundles_post_ra>
